<compile_context>
chip_gen: v6e
topology: v6e:2x2x1
jax: 0.10.0
libtpu: 0.0.40
codegen_flags: <defaults>
</compile_context>

<pallas_src>
import jax
import jax.numpy as jnp
from jax.experimental import pallas as pl
from jax.experimental.pallas import tpu as pltpu

KSIZE = 3      # ConvModel uses range(3, 4) -> a single Conv1d with kernel_size=3
LANES = 128    # TPU lane width: packed weight slab / output lane dimension
SUB = 8        # TPU sublane granularity


def _round_up(n, m):
    return ((n + m - 1) // m) * m


# ------------------------------ Param packing -------------------------------- #

def prepare_params(embed, conv_w, conv_b, mlp_w, mlp_b):
    """One-time weight packing (outside the per-call forward path).

    Every piece starts at an 8-aligned row of a single zero-padded (rows, 128)
    f32 slab, so the kernel uses static aligned slices and the whole parameter
    set moves HBM->VMEM with one DMA.  Conv tap k is stored as conv_w[:,:,k].T.
    """
    H, E, K = conv_w.shape
    assert K == KSIZE
    pieces = [jnp.transpose(conv_w[:, :, k]) for k in range(K)]      # K x (E, H)
    pieces.append(conv_b.reshape(1, H))                              # (1, H)
    mlp_dims = []
    for w, b in zip(mlp_w, mlp_b):
        pieces.append(w)                                             # (din, dout)
        pieces.append(b.reshape(1, -1))                              # (1, dout)
        mlp_dims.append((int(w.shape[0]), int(w.shape[1])))

    offsets, row = [], 0
    for p in pieces:
        assert p.shape[1] <= LANES
        offsets.append(row)
        row += _round_up(p.shape[0], SUB)
    slab = jnp.zeros((max(row, SUB), LANES), jnp.float32)
    for off, p in zip(offsets, pieces):
        slab = slab.at[off:off + p.shape[0], :p.shape[1]].set(p.astype(jnp.float32))

    layout = dict(
        E=int(E), H=int(H), K=int(K),
        conv_w_offs=tuple(offsets[:K]),
        conv_b_off=offsets[K],
        mlp_offs=tuple(offsets[K + 1:]),
        mlp_dims=tuple(mlp_dims),
    )
    return {"embed": jnp.asarray(embed, jnp.float32), "slab": slab, "layout": layout}


# ------------------------------ Fused kernel --------------------------------- #

def make_fused_kernel(B, L, layout):
    E, H, K = layout["E"], layout["H"], layout["K"]
    T = L - K + 1                 # valid conv positions per sequence (needs L >= K)
    BL = B * L
    BL_PAD = BL + SUB             # zero tail so k-shifted views never run off the end
    B_PAD = _round_up(max(B, SUB), SUB)
    conv_w_offs = layout["conv_w_offs"]
    conv_b_off = layout["conv_b_off"]
    mlp_offs = layout["mlp_offs"]
    mlp_dims = layout["mlp_dims"]
    n_mlp = len(mlp_dims)

    def kernel(ids_ref, embed_hbm, slab_ref, out_ref, emb_buf, gather_sem):
        # --- zero the padding tail of the staging buffer (aligned 8-row store) ---
        emb_buf[pl.ds(BL, BL_PAD - BL), :] = jnp.zeros((BL_PAD - BL, E), jnp.float32)

        # --- real embedding gather: per-token row DMA, HBM -> VMEM ---------------
        # ids sit in SMEM; the table never needs to be VMEM-resident.
        for i in range(BL):
            tok = ids_ref[i]
            pltpu.make_async_copy(embed_hbm.at[pl.ds(tok, 1), :],
                                  emb_buf.at[pl.ds(i, 1), :],
                                  gather_sem.at[i]).start()
        for i in range(BL):
            tok = ids_ref[i]
            pltpu.make_async_copy(embed_hbm.at[pl.ds(tok, 1), :],
                                  emb_buf.at[pl.ds(i, 1), :],
                                  gather_sem.at[i]).wait()

        # --- Conv1d(k=K): K accumulated matmuls on sublane-shifted views ---------
        # acc[b*L + t, :] = sum_k emb[b*L + t + k, :] @ W_k   (tail rows read zeros)
        acc = jnp.dot(emb_buf[pl.ds(0, BL), :],
                      slab_ref[pl.ds(conv_w_offs[0], E), pl.ds(0, H)],
                      preferred_element_type=jnp.float32)
        for k in range(1, K):
            acc += jnp.dot(emb_buf[pl.ds(k, BL), :],
                           slab_ref[pl.ds(conv_w_offs[k], E), pl.ds(0, H)],
                           preferred_element_type=jnp.float32)
        acc += slab_ref[pl.ds(conv_b_off, 1), pl.ds(0, H)]           # (1, H) bias
        acc = jnp.maximum(acc, 0.0)                                  # ReLU

        # --- masked per-sequence time max (vectorized, no per-batch slices) ------
        acc = acc.reshape(B, L, H)
        t_idx = jax.lax.broadcasted_iota(jnp.int32, (B, L, H), 1)
        # positions t >= T mix the next sequence / zero padding -> drop them.
        # Masking with 0 is exact: post-ReLU values are >= 0 and T >= 1.
        acc = jnp.where(t_idx < T, acc, 0.0)
        h = jnp.max(acc, axis=1)                                     # (B, H)

        # --- pad batch rows once so MLP matmuls + final store are full vregs -----
        if B_PAD > B:
            h = jnp.concatenate(
                [h, jnp.zeros((B_PAD - B, H), jnp.float32)], axis=0)

        # --- MLP: Linear+ReLU hidden layers; final Linear at full 128 lanes ------
        for i, (din, dout) in enumerate(mlp_dims):
            last = i == n_mlp - 1
            ncols = LANES if last else dout          # lane-dense final layer/store
            w = slab_ref[pl.ds(mlp_offs[2 * i], din), pl.ds(0, ncols)]
            b = slab_ref[pl.ds(mlp_offs[2 * i + 1], 1), pl.ds(0, ncols)]
            h = jnp.dot(h, w, preferred_element_type=jnp.float32) + b
            if last:
                h = pl.reciprocal(1.0 + jnp.exp(-h), approx=True)    # sigmoid (EUP)
            else:
                h = jnp.maximum(h, 0.0)                              # ReLU

        out_ref[...] = h                                             # (B_PAD, 128)

    return kernel, BL_PAD, B_PAD


# -------------------------------- Wrapper ------------------------------------ #

def conv_model_forward(sentence_ids, sentence_lengths, params):
    """Fully fused forward. sentence_lengths is unused (matches ConvModel.forward)."""
    del sentence_lengths
    B, L = sentence_ids.shape
    layout = params["layout"]
    assert L >= layout["K"], "sequence length must be >= conv kernel size"
    C = layout["mlp_dims"][-1][1]
    BL = B * L

    kernel, BL_PAD, B_PAD = make_fused_kernel(B, L, layout)
    ids = sentence_ids.reshape(BL).astype(jnp.int32)

    # Single grid step: at B=2 the kernel is launch/DMA-bound; a batch grid axis
    # with dimension_semantics=("parallel",) only pays off at much larger B.
    out_padded = pl.pallas_call(
        kernel,
        out_shape=jax.ShapeDtypeStruct((B_PAD, LANES), jnp.float32),
        in_specs=[
            pl.BlockSpec(memory_space=pltpu.MemorySpace.SMEM),    # token ids
            pl.BlockSpec(memory_space=pl.ANY),                    # embedding table (HBM)
            pl.BlockSpec(memory_space=pltpu.MemorySpace.VMEM),    # packed weight slab
        ],
        out_specs=pl.BlockSpec(memory_space=pltpu.MemorySpace.VMEM),
        scratch_shapes=[
            pltpu.VMEM((BL_PAD, layout["E"]), jnp.float32),       # gathered embeddings
            pltpu.SemaphoreType.DMA((BL,)),                       # one sem per row DMA
        ],
    )(ids, params["embed"], params["slab"])
    return out_padded[:B, :C]


# --------------------------- Pure-JAX reference ------------------------------- #

def reference_forward(sentence_ids, embed, conv_w, conv_b, mlp_w, mlp_b):
    x = jnp.take(embed, sentence_ids, axis=0)                        # (B, L, E)
    H, E, K = conv_w.shape
    B, L, _ = x.shape
    T = L - K + 1
    acc = jnp.zeros((B, T, H), jnp.float32)
    for k in range(K):
        acc = acc + jnp.einsum("ble,he->blh", x[:, k:k + T, :], conv_w[:, :, k],
                               precision=jax.lax.Precision.HIGHEST)
    acc = jnp.maximum(acc + conv_b, 0.0)
    h = jnp.max(acc, axis=1)                                         # (B, H)
    for i, (w, b) in enumerate(zip(mlp_w, mlp_b)):
        h = jnp.dot(h, w, precision=jax.lax.Precision.HIGHEST) + b
        if i < len(mlp_w) - 1:
            h = jnp.maximum(h, 0.0)
    return 1.0 / (1.0 + jnp.exp(-h))


# ---------------------------------- Main -------------------------------------- #

if __name__ == "__main__":
    B, L = 2, 16
    vocab_size, E, H = 50, 32, 16          # embedding_size=32, conv_hidden=16
    mlp_units = [32]
    output_classes = 4

    key = jax.random.PRNGKey(0)
    keys = jax.random.split(key, 10)

    embed = jax.random.normal(keys[0], (vocab_size, E), jnp.float32) * 0.1
    embed = embed.at[0].set(0.0)           # padding_idx=0

    conv_w = jax.random.normal(keys[1], (H, E, KSIZE), jnp.float32) * 0.1
    conv_b = jax.random.normal(keys[2], (H,), jnp.float32) * 0.1

    dims = [H] + mlp_units + [output_classes]
    mlp_w, mlp_b = [], []
    for i in range(len(dims) - 1):
        mlp_w.append(jax.random.normal(keys[3 + 2 * i], (dims[i], dims[i + 1]),
                                       jnp.float32) * 0.1)
        mlp_b.append(jax.random.normal(keys[4 + 2 * i], (dims[i + 1],),
                                       jnp.float32) * 0.1)

    params = prepare_params(embed, conv_w, conv_b, mlp_w, mlp_b)

    sentence_ids = jax.random.randint(keys[9], (B, L), 0, vocab_size)
    sentence_lengths = jnp.full((B,), L, jnp.float32)

    out = conv_model_forward(sentence_ids, sentence_lengths, params)
    out = jax.block_until_ready(out)

    ref = reference_forward(sentence_ids, embed, conv_w, conv_b, mlp_w, mlp_b)
    ref = jax.block_until_ready(ref)

    assert out.shape == (B, output_classes)
    assert bool(jnp.all(jnp.isfinite(out))) and bool(jnp.all((out >= 0) & (out <= 1)))
    assert bool(jnp.allclose(out, ref, rtol=2e-3, atol=2e-3)), "mismatch vs pure-JAX reference"
    print("KERNEL_OK")
</pallas_src>

<mosaic_0001>
module attributes {stable_mosaic.version = 11 : i64} {
  func.func @kernel(%arg0: memref<32xi32, #tpu.memory_space<smem>>, %arg1: memref<50x32xf32, #tpu.memory_space<any>>, %arg2: memref<168x128xf32, #tpu.memory_space<vmem>>, %arg3: memref<8x128xf32, #tpu.memory_space<vmem>>, %arg4: memref<40x32xf32, #tpu.memory_space<vmem>>, %arg5: memref<32x!tpu.dma_semaphore, #tpu.memory_space<semaphore_mem>>) attributes {dimension_semantics = [], scalar_prefetch = 0 : i64, scratch_operands = 2 : i64, tpu.core_type = #tpu.core_type<tc>} {
    %cst = arith.constant 0.000000e+00 : f32
    %0 = vector.broadcast %cst : f32 to vector<8x32xf32>
    %c32 = arith.constant 32 : index
    %c0 = arith.constant 0 : index
    %1 = vector.load %arg4[%c32, %c0] : memref<40x32xf32, #tpu.memory_space<vmem>>, vector<8x32xf32>
    tpu.vector_store %arg4[%c32, %c0], %0 {strides = array<i32>} : memref<40x32xf32, #tpu.memory_space<vmem>>, vector<8x32xf32>,
    %c0_0 = arith.constant 0 : index
    %2 = memref.load %arg0[%c0_0] : memref<32xi32, #tpu.memory_space<smem>>
    %c0_i32 = arith.constant 0 : i32
    %c0_i32_1 = arith.constant 0 : i32
    %3 = tpu.memref_slice %arg1[%2, %c0_i32_1] : memref<50x32xf32, #tpu.memory_space<any>> -> memref<1x32xf32, #tpu.memory_space<any>>
    %c0_i32_2 = arith.constant 0 : i32
    %c0_i32_3 = arith.constant 0 : i32
    %4 = tpu.memref_slice %arg4[%c0_i32_2, %c0_i32_3] : memref<40x32xf32, #tpu.memory_space<vmem>> -> memref<1x32xf32, #tpu.memory_space<vmem>>
    %5 = tpu.memref_slice %arg5[%c0_i32] : memref<32x!tpu.dma_semaphore, #tpu.memory_space<semaphore_mem>> -> memref<1x!tpu.dma_semaphore, #tpu.memory_space<semaphore_mem>>
    %6 = tpu.memref_squeeze %5 : memref<1x!tpu.dma_semaphore, #tpu.memory_space<semaphore_mem>> -> memref<!tpu.dma_semaphore, #tpu.memory_space<semaphore_mem>>
    tpu.enqueue_dma source(%3 : memref<1x32xf32, #tpu.memory_space<any>>) target(%4 : memref<1x32xf32, #tpu.memory_space<vmem>>) target_semaphore(%6 : memref<!tpu.dma_semaphore, #tpu.memory_space<semaphore_mem>>)
    %c1 = arith.constant 1 : index
    %7 = memref.load %arg0[%c1] : memref<32xi32, #tpu.memory_space<smem>>
    %c1_i32 = arith.constant 1 : i32
    %c0_i32_4 = arith.constant 0 : i32
    %8 = tpu.memref_slice %arg1[%7, %c0_i32_4] : memref<50x32xf32, #tpu.memory_space<any>> -> memref<1x32xf32, #tpu.memory_space<any>>
    %c1_i32_5 = arith.constant 1 : i32
    %c0_i32_6 = arith.constant 0 : i32
    %9 = tpu.memref_slice %arg4[%c1_i32_5, %c0_i32_6] : memref<40x32xf32, #tpu.memory_space<vmem>> -> memref<1x32xf32, #tpu.memory_space<vmem>>
    %10 = tpu.memref_slice %arg5[%c1_i32] : memref<32x!tpu.dma_semaphore, #tpu.memory_space<semaphore_mem>> -> memref<1x!tpu.dma_semaphore, #tpu.memory_space<semaphore_mem>>
    %11 = tpu.memref_squeeze %10 : memref<1x!tpu.dma_semaphore, #tpu.memory_space<semaphore_mem>> -> memref<!tpu.dma_semaphore, #tpu.memory_space<semaphore_mem>>
    tpu.enqueue_dma source(%8 : memref<1x32xf32, #tpu.memory_space<any>>) target(%9 : memref<1x32xf32, #tpu.memory_space<vmem>>) target_semaphore(%11 : memref<!tpu.dma_semaphore, #tpu.memory_space<semaphore_mem>>)
    %c2 = arith.constant 2 : index
    %12 = memref.load %arg0[%c2] : memref<32xi32, #tpu.memory_space<smem>>
    %c2_i32 = arith.constant 2 : i32
    %c0_i32_7 = arith.constant 0 : i32
    %13 = tpu.memref_slice %arg1[%12, %c0_i32_7] : memref<50x32xf32, #tpu.memory_space<any>> -> memref<1x32xf32, #tpu.memory_space<any>>
    %c2_i32_8 = arith.constant 2 : i32
    %c0_i32_9 = arith.constant 0 : i32
    %14 = tpu.memref_slice %arg4[%c2_i32_8, %c0_i32_9] : memref<40x32xf32, #tpu.memory_space<vmem>> -> memref<1x32xf32, #tpu.memory_space<vmem>>
    %15 = tpu.memref_slice %arg5[%c2_i32] : memref<32x!tpu.dma_semaphore, #tpu.memory_space<semaphore_mem>> -> memref<1x!tpu.dma_semaphore, #tpu.memory_space<semaphore_mem>>
    %16 = tpu.memref_squeeze %15 : memref<1x!tpu.dma_semaphore, #tpu.memory_space<semaphore_mem>> -> memref<!tpu.dma_semaphore, #tpu.memory_space<semaphore_mem>>
    tpu.enqueue_dma source(%13 : memref<1x32xf32, #tpu.memory_space<any>>) target(%14 : memref<1x32xf32, #tpu.memory_space<vmem>>) target_semaphore(%16 : memref<!tpu.dma_semaphore, #tpu.memory_space<semaphore_mem>>)
    %c3 = arith.constant 3 : index
    %17 = memref.load %arg0[%c3] : memref<32xi32, #tpu.memory_space<smem>>
    %c3_i32 = arith.constant 3 : i32
    %c0_i32_10 = arith.constant 0 : i32
    %18 = tpu.memref_slice %arg1[%17, %c0_i32_10] : memref<50x32xf32, #tpu.memory_space<any>> -> memref<1x32xf32, #tpu.memory_space<any>>
    %c3_i32_11 = arith.constant 3 : i32
    %c0_i32_12 = arith.constant 0 : i32
    %19 = tpu.memref_slice %arg4[%c3_i32_11, %c0_i32_12] : memref<40x32xf32, #tpu.memory_space<vmem>> -> memref<1x32xf32, #tpu.memory_space<vmem>>
    %20 = tpu.memref_slice %arg5[%c3_i32] : memref<32x!tpu.dma_semaphore, #tpu.memory_space<semaphore_mem>> -> memref<1x!tpu.dma_semaphore, #tpu.memory_space<semaphore_mem>>
    %21 = tpu.memref_squeeze %20 : memref<1x!tpu.dma_semaphore, #tpu.memory_space<semaphore_mem>> -> memref<!tpu.dma_semaphore, #tpu.memory_space<semaphore_mem>>
    tpu.enqueue_dma source(%18 : memref<1x32xf32, #tpu.memory_space<any>>) target(%19 : memref<1x32xf32, #tpu.memory_space<vmem>>) target_semaphore(%21 : memref<!tpu.dma_semaphore, #tpu.memory_space<semaphore_mem>>)
    %c4 = arith.constant 4 : index
    %22 = memref.load %arg0[%c4] : memref<32xi32, #tpu.memory_space<smem>>
    %c4_i32 = arith.constant 4 : i32
    %c0_i32_13 = arith.constant 0 : i32
    %23 = tpu.memref_slice %arg1[%22, %c0_i32_13] : memref<50x32xf32, #tpu.memory_space<any>> -> memref<1x32xf32, #tpu.memory_space<any>>
    %c4_i32_14 = arith.constant 4 : i32
    %c0_i32_15 = arith.constant 0 : i32
    %24 = tpu.memref_slice %arg4[%c4_i32_14, %c0_i32_15] : memref<40x32xf32, #tpu.memory_space<vmem>> -> memref<1x32xf32, #tpu.memory_space<vmem>>
    %25 = tpu.memref_slice %arg5[%c4_i32] : memref<32x!tpu.dma_semaphore, #tpu.memory_space<semaphore_mem>> -> memref<1x!tpu.dma_semaphore, #tpu.memory_space<semaphore_mem>>
    %26 = tpu.memref_squeeze %25 : memref<1x!tpu.dma_semaphore, #tpu.memory_space<semaphore_mem>> -> memref<!tpu.dma_semaphore, #tpu.memory_space<semaphore_mem>>
    tpu.enqueue_dma source(%23 : memref<1x32xf32, #tpu.memory_space<any>>) target(%24 : memref<1x32xf32, #tpu.memory_space<vmem>>) target_semaphore(%26 : memref<!tpu.dma_semaphore, #tpu.memory_space<semaphore_mem>>)
    %c5 = arith.constant 5 : index
    %27 = memref.load %arg0[%c5] : memref<32xi32, #tpu.memory_space<smem>>
    %c5_i32 = arith.constant 5 : i32
    %c0_i32_16 = arith.constant 0 : i32
    %28 = tpu.memref_slice %arg1[%27, %c0_i32_16] : memref<50x32xf32, #tpu.memory_space<any>> -> memref<1x32xf32, #tpu.memory_space<any>>
    %c5_i32_17 = arith.constant 5 : i32
    %c0_i32_18 = arith.constant 0 : i32
    %29 = tpu.memref_slice %arg4[%c5_i32_17, %c0_i32_18] : memref<40x32xf32, #tpu.memory_space<vmem>> -> memref<1x32xf32, #tpu.memory_space<vmem>>
    %30 = tpu.memref_slice %arg5[%c5_i32] : memref<32x!tpu.dma_semaphore, #tpu.memory_space<semaphore_mem>> -> memref<1x!tpu.dma_semaphore, #tpu.memory_space<semaphore_mem>>
    %31 = tpu.memref_squeeze %30 : memref<1x!tpu.dma_semaphore, #tpu.memory_space<semaphore_mem>> -> memref<!tpu.dma_semaphore, #tpu.memory_space<semaphore_mem>>
    tpu.enqueue_dma source(%28 : memref<1x32xf32, #tpu.memory_space<any>>) target(%29 : memref<1x32xf32, #tpu.memory_space<vmem>>) target_semaphore(%31 : memref<!tpu.dma_semaphore, #tpu.memory_space<semaphore_mem>>)
    %c6 = arith.constant 6 : index
    %32 = memref.load %arg0[%c6] : memref<32xi32, #tpu.memory_space<smem>>
    %c6_i32 = arith.constant 6 : i32
    %c0_i32_19 = arith.constant 0 : i32
    %33 = tpu.memref_slice %arg1[%32, %c0_i32_19] : memref<50x32xf32, #tpu.memory_space<any>> -> memref<1x32xf32, #tpu.memory_space<any>>
    %c6_i32_20 = arith.constant 6 : i32
    %c0_i32_21 = arith.constant 0 : i32
    %34 = tpu.memref_slice %arg4[%c6_i32_20, %c0_i32_21] : memref<40x32xf32, #tpu.memory_space<vmem>> -> memref<1x32xf32, #tpu.memory_space<vmem>>
    %35 = tpu.memref_slice %arg5[%c6_i32] : memref<32x!tpu.dma_semaphore, #tpu.memory_space<semaphore_mem>> -> memref<1x!tpu.dma_semaphore, #tpu.memory_space<semaphore_mem>>
    %36 = tpu.memref_squeeze %35 : memref<1x!tpu.dma_semaphore, #tpu.memory_space<semaphore_mem>> -> memref<!tpu.dma_semaphore, #tpu.memory_space<semaphore_mem>>
    tpu.enqueue_dma source(%33 : memref<1x32xf32, #tpu.memory_space<any>>) target(%34 : memref<1x32xf32, #tpu.memory_space<vmem>>) target_semaphore(%36 : memref<!tpu.dma_semaphore, #tpu.memory_space<semaphore_mem>>)
    %c7 = arith.constant 7 : index
    %37 = memref.load %arg0[%c7] : memref<32xi32, #tpu.memory_space<smem>>
    %c7_i32 = arith.constant 7 : i32
    %c0_i32_22 = arith.constant 0 : i32
    %38 = tpu.memref_slice %arg1[%37, %c0_i32_22] : memref<50x32xf32, #tpu.memory_space<any>> -> memref<1x32xf32, #tpu.memory_space<any>>
    %c7_i32_23 = arith.constant 7 : i32
    %c0_i32_24 = arith.constant 0 : i32
    %39 = tpu.memref_slice %arg4[%c7_i32_23, %c0_i32_24] : memref<40x32xf32, #tpu.memory_space<vmem>> -> memref<1x32xf32, #tpu.memory_space<vmem>>
    %40 = tpu.memref_slice %arg5[%c7_i32] : memref<32x!tpu.dma_semaphore, #tpu.memory_space<semaphore_mem>> -> memref<1x!tpu.dma_semaphore, #tpu.memory_space<semaphore_mem>>
    %41 = tpu.memref_squeeze %40 : memref<1x!tpu.dma_semaphore, #tpu.memory_space<semaphore_mem>> -> memref<!tpu.dma_semaphore, #tpu.memory_space<semaphore_mem>>
    tpu.enqueue_dma source(%38 : memref<1x32xf32, #tpu.memory_space<any>>) target(%39 : memref<1x32xf32, #tpu.memory_space<vmem>>) target_semaphore(%41 : memref<!tpu.dma_semaphore, #tpu.memory_space<semaphore_mem>>)
    %c8 = arith.constant 8 : index
    %42 = memref.load %arg0[%c8] : memref<32xi32, #tpu.memory_space<smem>>
    %c8_i32 = arith.constant 8 : i32
    %c0_i32_25 = arith.constant 0 : i32
    %43 = tpu.memref_slice %arg1[%42, %c0_i32_25] : memref<50x32xf32, #tpu.memory_space<any>> -> memref<1x32xf32, #tpu.memory_space<any>>
    %c8_i32_26 = arith.constant 8 : i32
    %c0_i32_27 = arith.constant 0 : i32
    %44 = tpu.memref_slice %arg4[%c8_i32_26, %c0_i32_27] : memref<40x32xf32, #tpu.memory_space<vmem>> -> memref<1x32xf32, #tpu.memory_space<vmem>>
    %45 = tpu.memref_slice %arg5[%c8_i32] : memref<32x!tpu.dma_semaphore, #tpu.memory_space<semaphore_mem>> -> memref<1x!tpu.dma_semaphore, #tpu.memory_space<semaphore_mem>>
    %46 = tpu.memref_squeeze %45 : memref<1x!tpu.dma_semaphore, #tpu.memory_space<semaphore_mem>> -> memref<!tpu.dma_semaphore, #tpu.memory_space<semaphore_mem>>
    tpu.enqueue_dma source(%43 : memref<1x32xf32, #tpu.memory_space<any>>) target(%44 : memref<1x32xf32, #tpu.memory_space<vmem>>) target_semaphore(%46 : memref<!tpu.dma_semaphore, #tpu.memory_space<semaphore_mem>>)
    %c9 = arith.constant 9 : index
    %47 = memref.load %arg0[%c9] : memref<32xi32, #tpu.memory_space<smem>>
    %c9_i32 = arith.constant 9 : i32
    %c0_i32_28 = arith.constant 0 : i32
    %48 = tpu.memref_slice %arg1[%47, %c0_i32_28] : memref<50x32xf32, #tpu.memory_space<any>> -> memref<1x32xf32, #tpu.memory_space<any>>
    %c9_i32_29 = arith.constant 9 : i32
    %c0_i32_30 = arith.constant 0 : i32
    %49 = tpu.memref_slice %arg4[%c9_i32_29, %c0_i32_30] : memref<40x32xf32, #tpu.memory_space<vmem>> -> memref<1x32xf32, #tpu.memory_space<vmem>>
    %50 = tpu.memref_slice %arg5[%c9_i32] : memref<32x!tpu.dma_semaphore, #tpu.memory_space<semaphore_mem>> -> memref<1x!tpu.dma_semaphore, #tpu.memory_space<semaphore_mem>>
    %51 = tpu.memref_squeeze %50 : memref<1x!tpu.dma_semaphore, #tpu.memory_space<semaphore_mem>> -> memref<!tpu.dma_semaphore, #tpu.memory_space<semaphore_mem>>
    tpu.enqueue_dma source(%48 : memref<1x32xf32, #tpu.memory_space<any>>) target(%49 : memref<1x32xf32, #tpu.memory_space<vmem>>) target_semaphore(%51 : memref<!tpu.dma_semaphore, #tpu.memory_space<semaphore_mem>>)
    %c10 = arith.constant 10 : index
    %52 = memref.load %arg0[%c10] : memref<32xi32, #tpu.memory_space<smem>>
    %c10_i32 = arith.constant 10 : i32
    %c0_i32_31 = arith.constant 0 : i32
    %53 = tpu.memref_slice %arg1[%52, %c0_i32_31] : memref<50x32xf32, #tpu.memory_space<any>> -> memref<1x32xf32, #tpu.memory_space<any>>
    %c10_i32_32 = arith.constant 10 : i32
    %c0_i32_33 = arith.constant 0 : i32
    %54 = tpu.memref_slice %arg4[%c10_i32_32, %c0_i32_33] : memref<40x32xf32, #tpu.memory_space<vmem>> -> memref<1x32xf32, #tpu.memory_space<vmem>>
    %55 = tpu.memref_slice %arg5[%c10_i32] : memref<32x!tpu.dma_semaphore, #tpu.memory_space<semaphore_mem>> -> memref<1x!tpu.dma_semaphore, #tpu.memory_space<semaphore_mem>>
    %56 = tpu.memref_squeeze %55 : memref<1x!tpu.dma_semaphore, #tpu.memory_space<semaphore_mem>> -> memref<!tpu.dma_semaphore, #tpu.memory_space<semaphore_mem>>
    tpu.enqueue_dma source(%53 : memref<1x32xf32, #tpu.memory_space<any>>) target(%54 : memref<1x32xf32, #tpu.memory_space<vmem>>) target_semaphore(%56 : memref<!tpu.dma_semaphore, #tpu.memory_space<semaphore_mem>>)
    %c11 = arith.constant 11 : index
    %57 = memref.load %arg0[%c11] : memref<32xi32, #tpu.memory_space<smem>>
    %c11_i32 = arith.constant 11 : i32
    %c0_i32_34 = arith.constant 0 : i32
    %58 = tpu.memref_slice %arg1[%57, %c0_i32_34] : memref<50x32xf32, #tpu.memory_space<any>> -> memref<1x32xf32, #tpu.memory_space<any>>
    %c11_i32_35 = arith.constant 11 : i32
    %c0_i32_36 = arith.constant 0 : i32
    %59 = tpu.memref_slice %arg4[%c11_i32_35, %c0_i32_36] : memref<40x32xf32, #tpu.memory_space<vmem>> -> memref<1x32xf32, #tpu.memory_space<vmem>>
    %60 = tpu.memref_slice %arg5[%c11_i32] : memref<32x!tpu.dma_semaphore, #tpu.memory_space<semaphore_mem>> -> memref<1x!tpu.dma_semaphore, #tpu.memory_space<semaphore_mem>>
    %61 = tpu.memref_squeeze %60 : memref<1x!tpu.dma_semaphore, #tpu.memory_space<semaphore_mem>> -> memref<!tpu.dma_semaphore, #tpu.memory_space<semaphore_mem>>
    tpu.enqueue_dma source(%58 : memref<1x32xf32, #tpu.memory_space<any>>) target(%59 : memref<1x32xf32, #tpu.memory_space<vmem>>) target_semaphore(%61 : memref<!tpu.dma_semaphore, #tpu.memory_space<semaphore_mem>>)
    %c12 = arith.constant 12 : index
    %62 = memref.load %arg0[%c12] : memref<32xi32, #tpu.memory_space<smem>>
    %c12_i32 = arith.constant 12 : i32
    %c0_i32_37 = arith.constant 0 : i32
    %63 = tpu.memref_slice %arg1[%62, %c0_i32_37] : memref<50x32xf32, #tpu.memory_space<any>> -> memref<1x32xf32, #tpu.memory_space<any>>
    %c12_i32_38 = arith.constant 12 : i32
    %c0_i32_39 = arith.constant 0 : i32
    %64 = tpu.memref_slice %arg4[%c12_i32_38, %c0_i32_39] : memref<40x32xf32, #tpu.memory_space<vmem>> -> memref<1x32xf32, #tpu.memory_space<vmem>>
    %65 = tpu.memref_slice %arg5[%c12_i32] : memref<32x!tpu.dma_semaphore, #tpu.memory_space<semaphore_mem>> -> memref<1x!tpu.dma_semaphore, #tpu.memory_space<semaphore_mem>>
    %66 = tpu.memref_squeeze %65 : memref<1x!tpu.dma_semaphore, #tpu.memory_space<semaphore_mem>> -> memref<!tpu.dma_semaphore, #tpu.memory_space<semaphore_mem>>
    tpu.enqueue_dma source(%63 : memref<1x32xf32, #tpu.memory_space<any>>) target(%64 : memref<1x32xf32, #tpu.memory_space<vmem>>) target_semaphore(%66 : memref<!tpu.dma_semaphore, #tpu.memory_space<semaphore_mem>>)
    %c13 = arith.constant 13 : index
    %67 = memref.load %arg0[%c13] : memref<32xi32, #tpu.memory_space<smem>>
    %c13_i32 = arith.constant 13 : i32
    %c0_i32_40 = arith.constant 0 : i32
    %68 = tpu.memref_slice %arg1[%67, %c0_i32_40] : memref<50x32xf32, #tpu.memory_space<any>> -> memref<1x32xf32, #tpu.memory_space<any>>
    %c13_i32_41 = arith.constant 13 : i32
    %c0_i32_42 = arith.constant 0 : i32
    %69 = tpu.memref_slice %arg4[%c13_i32_41, %c0_i32_42] : memref<40x32xf32, #tpu.memory_space<vmem>> -> memref<1x32xf32, #tpu.memory_space<vmem>>
    %70 = tpu.memref_slice %arg5[%c13_i32] : memref<32x!tpu.dma_semaphore, #tpu.memory_space<semaphore_mem>> -> memref<1x!tpu.dma_semaphore, #tpu.memory_space<semaphore_mem>>
    %71 = tpu.memref_squeeze %70 : memref<1x!tpu.dma_semaphore, #tpu.memory_space<semaphore_mem>> -> memref<!tpu.dma_semaphore, #tpu.memory_space<semaphore_mem>>
    tpu.enqueue_dma source(%68 : memref<1x32xf32, #tpu.memory_space<any>>) target(%69 : memref<1x32xf32, #tpu.memory_space<vmem>>) target_semaphore(%71 : memref<!tpu.dma_semaphore, #tpu.memory_space<semaphore_mem>>)
    %c14 = arith.constant 14 : index
    %72 = memref.load %arg0[%c14] : memref<32xi32, #tpu.memory_space<smem>>
    %c14_i32 = arith.constant 14 : i32
    %c0_i32_43 = arith.constant 0 : i32
    %73 = tpu.memref_slice %arg1[%72, %c0_i32_43] : memref<50x32xf32, #tpu.memory_space<any>> -> memref<1x32xf32, #tpu.memory_space<any>>
    %c14_i32_44 = arith.constant 14 : i32
    %c0_i32_45 = arith.constant 0 : i32
    %74 = tpu.memref_slice %arg4[%c14_i32_44, %c0_i32_45] : memref<40x32xf32, #tpu.memory_space<vmem>> -> memref<1x32xf32, #tpu.memory_space<vmem>>
    %75 = tpu.memref_slice %arg5[%c14_i32] : memref<32x!tpu.dma_semaphore, #tpu.memory_space<semaphore_mem>> -> memref<1x!tpu.dma_semaphore, #tpu.memory_space<semaphore_mem>>
    %76 = tpu.memref_squeeze %75 : memref<1x!tpu.dma_semaphore, #tpu.memory_space<semaphore_mem>> -> memref<!tpu.dma_semaphore, #tpu.memory_space<semaphore_mem>>
    tpu.enqueue_dma source(%73 : memref<1x32xf32, #tpu.memory_space<any>>) target(%74 : memref<1x32xf32, #tpu.memory_space<vmem>>) target_semaphore(%76 : memref<!tpu.dma_semaphore, #tpu.memory_space<semaphore_mem>>)
    %c15 = arith.constant 15 : index
    %77 = memref.load %arg0[%c15] : memref<32xi32, #tpu.memory_space<smem>>
    %c15_i32 = arith.constant 15 : i32
    %c0_i32_46 = arith.constant 0 : i32
    %78 = tpu.memref_slice %arg1[%77, %c0_i32_46] : memref<50x32xf32, #tpu.memory_space<any>> -> memref<1x32xf32, #tpu.memory_space<any>>
    %c15_i32_47 = arith.constant 15 : i32
    %c0_i32_48 = arith.constant 0 : i32
    %79 = tpu.memref_slice %arg4[%c15_i32_47, %c0_i32_48] : memref<40x32xf32, #tpu.memory_space<vmem>> -> memref<1x32xf32, #tpu.memory_space<vmem>>
    %80 = tpu.memref_slice %arg5[%c15_i32] : memref<32x!tpu.dma_semaphore, #tpu.memory_space<semaphore_mem>> -> memref<1x!tpu.dma_semaphore, #tpu.memory_space<semaphore_mem>>
    %81 = tpu.memref_squeeze %80 : memref<1x!tpu.dma_semaphore, #tpu.memory_space<semaphore_mem>> -> memref<!tpu.dma_semaphore, #tpu.memory_space<semaphore_mem>>
    tpu.enqueue_dma source(%78 : memref<1x32xf32, #tpu.memory_space<any>>) target(%79 : memref<1x32xf32, #tpu.memory_space<vmem>>) target_semaphore(%81 : memref<!tpu.dma_semaphore, #tpu.memory_space<semaphore_mem>>)
    %c16 = arith.constant 16 : index
    %82 = memref.load %arg0[%c16] : memref<32xi32, #tpu.memory_space<smem>>
    %c16_i32 = arith.constant 16 : i32
    %c0_i32_49 = arith.constant 0 : i32
    %83 = tpu.memref_slice %arg1[%82, %c0_i32_49] : memref<50x32xf32, #tpu.memory_space<any>> -> memref<1x32xf32, #tpu.memory_space<any>>
    %c16_i32_50 = arith.constant 16 : i32
    %c0_i32_51 = arith.constant 0 : i32
    %84 = tpu.memref_slice %arg4[%c16_i32_50, %c0_i32_51] : memref<40x32xf32, #tpu.memory_space<vmem>> -> memref<1x32xf32, #tpu.memory_space<vmem>>
    %85 = tpu.memref_slice %arg5[%c16_i32] : memref<32x!tpu.dma_semaphore, #tpu.memory_space<semaphore_mem>> -> memref<1x!tpu.dma_semaphore, #tpu.memory_space<semaphore_mem>>
    %86 = tpu.memref_squeeze %85 : memref<1x!tpu.dma_semaphore, #tpu.memory_space<semaphore_mem>> -> memref<!tpu.dma_semaphore, #tpu.memory_space<semaphore_mem>>
    tpu.enqueue_dma source(%83 : memref<1x32xf32, #tpu.memory_space<any>>) target(%84 : memref<1x32xf32, #tpu.memory_space<vmem>>) target_semaphore(%86 : memref<!tpu.dma_semaphore, #tpu.memory_space<semaphore_mem>>)
    %c17 = arith.constant 17 : index
    %87 = memref.load %arg0[%c17] : memref<32xi32, #tpu.memory_space<smem>>
    %c17_i32 = arith.constant 17 : i32
    %c0_i32_52 = arith.constant 0 : i32
    %88 = tpu.memref_slice %arg1[%87, %c0_i32_52] : memref<50x32xf32, #tpu.memory_space<any>> -> memref<1x32xf32, #tpu.memory_space<any>>
    %c17_i32_53 = arith.constant 17 : i32
    %c0_i32_54 = arith.constant 0 : i32
    %89 = tpu.memref_slice %arg4[%c17_i32_53, %c0_i32_54] : memref<40x32xf32, #tpu.memory_space<vmem>> -> memref<1x32xf32, #tpu.memory_space<vmem>>
    %90 = tpu.memref_slice %arg5[%c17_i32] : memref<32x!tpu.dma_semaphore, #tpu.memory_space<semaphore_mem>> -> memref<1x!tpu.dma_semaphore, #tpu.memory_space<semaphore_mem>>
    %91 = tpu.memref_squeeze %90 : memref<1x!tpu.dma_semaphore, #tpu.memory_space<semaphore_mem>> -> memref<!tpu.dma_semaphore, #tpu.memory_space<semaphore_mem>>
    tpu.enqueue_dma source(%88 : memref<1x32xf32, #tpu.memory_space<any>>) target(%89 : memref<1x32xf32, #tpu.memory_space<vmem>>) target_semaphore(%91 : memref<!tpu.dma_semaphore, #tpu.memory_space<semaphore_mem>>)
    %c18 = arith.constant 18 : index
    %92 = memref.load %arg0[%c18] : memref<32xi32, #tpu.memory_space<smem>>
    %c18_i32 = arith.constant 18 : i32
    %c0_i32_55 = arith.constant 0 : i32
    %93 = tpu.memref_slice %arg1[%92, %c0_i32_55] : memref<50x32xf32, #tpu.memory_space<any>> -> memref<1x32xf32, #tpu.memory_space<any>>
    %c18_i32_56 = arith.constant 18 : i32
    %c0_i32_57 = arith.constant 0 : i32
    %94 = tpu.memref_slice %arg4[%c18_i32_56, %c0_i32_57] : memref<40x32xf32, #tpu.memory_space<vmem>> -> memref<1x32xf32, #tpu.memory_space<vmem>>
    %95 = tpu.memref_slice %arg5[%c18_i32] : memref<32x!tpu.dma_semaphore, #tpu.memory_space<semaphore_mem>> -> memref<1x!tpu.dma_semaphore, #tpu.memory_space<semaphore_mem>>
    %96 = tpu.memref_squeeze %95 : memref<1x!tpu.dma_semaphore, #tpu.memory_space<semaphore_mem>> -> memref<!tpu.dma_semaphore, #tpu.memory_space<semaphore_mem>>
    tpu.enqueue_dma source(%93 : memref<1x32xf32, #tpu.memory_space<any>>) target(%94 : memref<1x32xf32, #tpu.memory_space<vmem>>) target_semaphore(%96 : memref<!tpu.dma_semaphore, #tpu.memory_space<semaphore_mem>>)
    %c19 = arith.constant 19 : index
    %97 = memref.load %arg0[%c19] : memref<32xi32, #tpu.memory_space<smem>>
    %c19_i32 = arith.constant 19 : i32
    %c0_i32_58 = arith.constant 0 : i32
    %98 = tpu.memref_slice %arg1[%97, %c0_i32_58] : memref<50x32xf32, #tpu.memory_space<any>> -> memref<1x32xf32, #tpu.memory_space<any>>
    %c19_i32_59 = arith.constant 19 : i32
    %c0_i32_60 = arith.constant 0 : i32
    %99 = tpu.memref_slice %arg4[%c19_i32_59, %c0_i32_60] : memref<40x32xf32, #tpu.memory_space<vmem>> -> memref<1x32xf32, #tpu.memory_space<vmem>>
    %100 = tpu.memref_slice %arg5[%c19_i32] : memref<32x!tpu.dma_semaphore, #tpu.memory_space<semaphore_mem>> -> memref<1x!tpu.dma_semaphore, #tpu.memory_space<semaphore_mem>>
    %101 = tpu.memref_squeeze %100 : memref<1x!tpu.dma_semaphore, #tpu.memory_space<semaphore_mem>> -> memref<!tpu.dma_semaphore, #tpu.memory_space<semaphore_mem>>
    tpu.enqueue_dma source(%98 : memref<1x32xf32, #tpu.memory_space<any>>) target(%99 : memref<1x32xf32, #tpu.memory_space<vmem>>) target_semaphore(%101 : memref<!tpu.dma_semaphore, #tpu.memory_space<semaphore_mem>>)
    %c20 = arith.constant 20 : index
    %102 = memref.load %arg0[%c20] : memref<32xi32, #tpu.memory_space<smem>>
    %c20_i32 = arith.constant 20 : i32
    %c0_i32_61 = arith.constant 0 : i32
    %103 = tpu.memref_slice %arg1[%102, %c0_i32_61] : memref<50x32xf32, #tpu.memory_space<any>> -> memref<1x32xf32, #tpu.memory_space<any>>
    %c20_i32_62 = arith.constant 20 : i32
    %c0_i32_63 = arith.constant 0 : i32
    %104 = tpu.memref_slice %arg4[%c20_i32_62, %c0_i32_63] : memref<40x32xf32, #tpu.memory_space<vmem>> -> memref<1x32xf32, #tpu.memory_space<vmem>>
    %105 = tpu.memref_slice %arg5[%c20_i32] : memref<32x!tpu.dma_semaphore, #tpu.memory_space<semaphore_mem>> -> memref<1x!tpu.dma_semaphore, #tpu.memory_space<semaphore_mem>>
    %106 = tpu.memref_squeeze %105 : memref<1x!tpu.dma_semaphore, #tpu.memory_space<semaphore_mem>> -> memref<!tpu.dma_semaphore, #tpu.memory_space<semaphore_mem>>
    tpu.enqueue_dma source(%103 : memref<1x32xf32, #tpu.memory_space<any>>) target(%104 : memref<1x32xf32, #tpu.memory_space<vmem>>) target_semaphore(%106 : memref<!tpu.dma_semaphore, #tpu.memory_space<semaphore_mem>>)
    %c21 = arith.constant 21 : index
    %107 = memref.load %arg0[%c21] : memref<32xi32, #tpu.memory_space<smem>>
    %c21_i32 = arith.constant 21 : i32
    %c0_i32_64 = arith.constant 0 : i32
    %108 = tpu.memref_slice %arg1[%107, %c0_i32_64] : memref<50x32xf32, #tpu.memory_space<any>> -> memref<1x32xf32, #tpu.memory_space<any>>
    %c21_i32_65 = arith.constant 21 : i32
    %c0_i32_66 = arith.constant 0 : i32
    %109 = tpu.memref_slice %arg4[%c21_i32_65, %c0_i32_66] : memref<40x32xf32, #tpu.memory_space<vmem>> -> memref<1x32xf32, #tpu.memory_space<vmem>>
    %110 = tpu.memref_slice %arg5[%c21_i32] : memref<32x!tpu.dma_semaphore, #tpu.memory_space<semaphore_mem>> -> memref<1x!tpu.dma_semaphore, #tpu.memory_space<semaphore_mem>>
    %111 = tpu.memref_squeeze %110 : memref<1x!tpu.dma_semaphore, #tpu.memory_space<semaphore_mem>> -> memref<!tpu.dma_semaphore, #tpu.memory_space<semaphore_mem>>
    tpu.enqueue_dma source(%108 : memref<1x32xf32, #tpu.memory_space<any>>) target(%109 : memref<1x32xf32, #tpu.memory_space<vmem>>) target_semaphore(%111 : memref<!tpu.dma_semaphore, #tpu.memory_space<semaphore_mem>>)
    %c22 = arith.constant 22 : index
    %112 = memref.load %arg0[%c22] : memref<32xi32, #tpu.memory_space<smem>>
    %c22_i32 = arith.constant 22 : i32
    %c0_i32_67 = arith.constant 0 : i32
    %113 = tpu.memref_slice %arg1[%112, %c0_i32_67] : memref<50x32xf32, #tpu.memory_space<any>> -> memref<1x32xf32, #tpu.memory_space<any>>
    %c22_i32_68 = arith.constant 22 : i32
    %c0_i32_69 = arith.constant 0 : i32
    %114 = tpu.memref_slice %arg4[%c22_i32_68, %c0_i32_69] : memref<40x32xf32, #tpu.memory_space<vmem>> -> memref<1x32xf32, #tpu.memory_space<vmem>>
    %115 = tpu.memref_slice %arg5[%c22_i32] : memref<32x!tpu.dma_semaphore, #tpu.memory_space<semaphore_mem>> -> memref<1x!tpu.dma_semaphore, #tpu.memory_space<semaphore_mem>>
    %116 = tpu.memref_squeeze %115 : memref<1x!tpu.dma_semaphore, #tpu.memory_space<semaphore_mem>> -> memref<!tpu.dma_semaphore, #tpu.memory_space<semaphore_mem>>
    tpu.enqueue_dma source(%113 : memref<1x32xf32, #tpu.memory_space<any>>) target(%114 : memref<1x32xf32, #tpu.memory_space<vmem>>) target_semaphore(%116 : memref<!tpu.dma_semaphore, #tpu.memory_space<semaphore_mem>>)
    %c23 = arith.constant 23 : index
    %117 = memref.load %arg0[%c23] : memref<32xi32, #tpu.memory_space<smem>>
    %c23_i32 = arith.constant 23 : i32
    %c0_i32_70 = arith.constant 0 : i32
    %118 = tpu.memref_slice %arg1[%117, %c0_i32_70] : memref<50x32xf32, #tpu.memory_space<any>> -> memref<1x32xf32, #tpu.memory_space<any>>
    %c23_i32_71 = arith.constant 23 : i32
    %c0_i32_72 = arith.constant 0 : i32
    %119 = tpu.memref_slice %arg4[%c23_i32_71, %c0_i32_72] : memref<40x32xf32, #tpu.memory_space<vmem>> -> memref<1x32xf32, #tpu.memory_space<vmem>>
    %120 = tpu.memref_slice %arg5[%c23_i32] : memref<32x!tpu.dma_semaphore, #tpu.memory_space<semaphore_mem>> -> memref<1x!tpu.dma_semaphore, #tpu.memory_space<semaphore_mem>>
    %121 = tpu.memref_squeeze %120 : memref<1x!tpu.dma_semaphore, #tpu.memory_space<semaphore_mem>> -> memref<!tpu.dma_semaphore, #tpu.memory_space<semaphore_mem>>
    tpu.enqueue_dma source(%118 : memref<1x32xf32, #tpu.memory_space<any>>) target(%119 : memref<1x32xf32, #tpu.memory_space<vmem>>) target_semaphore(%121 : memref<!tpu.dma_semaphore, #tpu.memory_space<semaphore_mem>>)
    %c24 = arith.constant 24 : index
    %122 = memref.load %arg0[%c24] : memref<32xi32, #tpu.memory_space<smem>>
    %c24_i32 = arith.constant 24 : i32
    %c0_i32_73 = arith.constant 0 : i32
    %123 = tpu.memref_slice %arg1[%122, %c0_i32_73] : memref<50x32xf32, #tpu.memory_space<any>> -> memref<1x32xf32, #tpu.memory_space<any>>
    %c24_i32_74 = arith.constant 24 : i32
    %c0_i32_75 = arith.constant 0 : i32
    %124 = tpu.memref_slice %arg4[%c24_i32_74, %c0_i32_75] : memref<40x32xf32, #tpu.memory_space<vmem>> -> memref<1x32xf32, #tpu.memory_space<vmem>>
    %125 = tpu.memref_slice %arg5[%c24_i32] : memref<32x!tpu.dma_semaphore, #tpu.memory_space<semaphore_mem>> -> memref<1x!tpu.dma_semaphore, #tpu.memory_space<semaphore_mem>>
    %126 = tpu.memref_squeeze %125 : memref<1x!tpu.dma_semaphore, #tpu.memory_space<semaphore_mem>> -> memref<!tpu.dma_semaphore, #tpu.memory_space<semaphore_mem>>
    tpu.enqueue_dma source(%123 : memref<1x32xf32, #tpu.memory_space<any>>) target(%124 : memref<1x32xf32, #tpu.memory_space<vmem>>) target_semaphore(%126 : memref<!tpu.dma_semaphore, #tpu.memory_space<semaphore_mem>>)
    %c25 = arith.constant 25 : index
    %127 = memref.load %arg0[%c25] : memref<32xi32, #tpu.memory_space<smem>>
    %c25_i32 = arith.constant 25 : i32
    %c0_i32_76 = arith.constant 0 : i32
    %128 = tpu.memref_slice %arg1[%127, %c0_i32_76] : memref<50x32xf32, #tpu.memory_space<any>> -> memref<1x32xf32, #tpu.memory_space<any>>
    %c25_i32_77 = arith.constant 25 : i32
    %c0_i32_78 = arith.constant 0 : i32
    %129 = tpu.memref_slice %arg4[%c25_i32_77, %c0_i32_78] : memref<40x32xf32, #tpu.memory_space<vmem>> -> memref<1x32xf32, #tpu.memory_space<vmem>>
    %130 = tpu.memref_slice %arg5[%c25_i32] : memref<32x!tpu.dma_semaphore, #tpu.memory_space<semaphore_mem>> -> memref<1x!tpu.dma_semaphore, #tpu.memory_space<semaphore_mem>>
    %131 = tpu.memref_squeeze %130 : memref<1x!tpu.dma_semaphore, #tpu.memory_space<semaphore_mem>> -> memref<!tpu.dma_semaphore, #tpu.memory_space<semaphore_mem>>
    tpu.enqueue_dma source(%128 : memref<1x32xf32, #tpu.memory_space<any>>) target(%129 : memref<1x32xf32, #tpu.memory_space<vmem>>) target_semaphore(%131 : memref<!tpu.dma_semaphore, #tpu.memory_space<semaphore_mem>>)
    %c26 = arith.constant 26 : index
    %132 = memref.load %arg0[%c26] : memref<32xi32, #tpu.memory_space<smem>>
    %c26_i32 = arith.constant 26 : i32
    %c0_i32_79 = arith.constant 0 : i32
    %133 = tpu.memref_slice %arg1[%132, %c0_i32_79] : memref<50x32xf32, #tpu.memory_space<any>> -> memref<1x32xf32, #tpu.memory_space<any>>
    %c26_i32_80 = arith.constant 26 : i32
    %c0_i32_81 = arith.constant 0 : i32
    %134 = tpu.memref_slice %arg4[%c26_i32_80, %c0_i32_81] : memref<40x32xf32, #tpu.memory_space<vmem>> -> memref<1x32xf32, #tpu.memory_space<vmem>>
    %135 = tpu.memref_slice %arg5[%c26_i32] : memref<32x!tpu.dma_semaphore, #tpu.memory_space<semaphore_mem>> -> memref<1x!tpu.dma_semaphore, #tpu.memory_space<semaphore_mem>>
    %136 = tpu.memref_squeeze %135 : memref<1x!tpu.dma_semaphore, #tpu.memory_space<semaphore_mem>> -> memref<!tpu.dma_semaphore, #tpu.memory_space<semaphore_mem>>
    tpu.enqueue_dma source(%133 : memref<1x32xf32, #tpu.memory_space<any>>) target(%134 : memref<1x32xf32, #tpu.memory_space<vmem>>) target_semaphore(%136 : memref<!tpu.dma_semaphore, #tpu.memory_space<semaphore_mem>>)
    %c27 = arith.constant 27 : index
    %137 = memref.load %arg0[%c27] : memref<32xi32, #tpu.memory_space<smem>>
    %c27_i32 = arith.constant 27 : i32
    %c0_i32_82 = arith.constant 0 : i32
    %138 = tpu.memref_slice %arg1[%137, %c0_i32_82] : memref<50x32xf32, #tpu.memory_space<any>> -> memref<1x32xf32, #tpu.memory_space<any>>
    %c27_i32_83 = arith.constant 27 : i32
    %c0_i32_84 = arith.constant 0 : i32
    %139 = tpu.memref_slice %arg4[%c27_i32_83, %c0_i32_84] : memref<40x32xf32, #tpu.memory_space<vmem>> -> memref<1x32xf32, #tpu.memory_space<vmem>>
    %140 = tpu.memref_slice %arg5[%c27_i32] : memref<32x!tpu.dma_semaphore, #tpu.memory_space<semaphore_mem>> -> memref<1x!tpu.dma_semaphore, #tpu.memory_space<semaphore_mem>>
    %141 = tpu.memref_squeeze %140 : memref<1x!tpu.dma_semaphore, #tpu.memory_space<semaphore_mem>> -> memref<!tpu.dma_semaphore, #tpu.memory_space<semaphore_mem>>
    tpu.enqueue_dma source(%138 : memref<1x32xf32, #tpu.memory_space<any>>) target(%139 : memref<1x32xf32, #tpu.memory_space<vmem>>) target_semaphore(%141 : memref<!tpu.dma_semaphore, #tpu.memory_space<semaphore_mem>>)
    %c28 = arith.constant 28 : index
    %142 = memref.load %arg0[%c28] : memref<32xi32, #tpu.memory_space<smem>>
    %c28_i32 = arith.constant 28 : i32
    %c0_i32_85 = arith.constant 0 : i32
    %143 = tpu.memref_slice %arg1[%142, %c0_i32_85] : memref<50x32xf32, #tpu.memory_space<any>> -> memref<1x32xf32, #tpu.memory_space<any>>
    %c28_i32_86 = arith.constant 28 : i32
    %c0_i32_87 = arith.constant 0 : i32
    %144 = tpu.memref_slice %arg4[%c28_i32_86, %c0_i32_87] : memref<40x32xf32, #tpu.memory_space<vmem>> -> memref<1x32xf32, #tpu.memory_space<vmem>>
    %145 = tpu.memref_slice %arg5[%c28_i32] : memref<32x!tpu.dma_semaphore, #tpu.memory_space<semaphore_mem>> -> memref<1x!tpu.dma_semaphore, #tpu.memory_space<semaphore_mem>>
    %146 = tpu.memref_squeeze %145 : memref<1x!tpu.dma_semaphore, #tpu.memory_space<semaphore_mem>> -> memref<!tpu.dma_semaphore, #tpu.memory_space<semaphore_mem>>
    tpu.enqueue_dma source(%143 : memref<1x32xf32, #tpu.memory_space<any>>) target(%144 : memref<1x32xf32, #tpu.memory_space<vmem>>) target_semaphore(%146 : memref<!tpu.dma_semaphore, #tpu.memory_space<semaphore_mem>>)
    %c29 = arith.constant 29 : index
    %147 = memref.load %arg0[%c29] : memref<32xi32, #tpu.memory_space<smem>>
    %c29_i32 = arith.constant 29 : i32
    %c0_i32_88 = arith.constant 0 : i32
    %148 = tpu.memref_slice %arg1[%147, %c0_i32_88] : memref<50x32xf32, #tpu.memory_space<any>> -> memref<1x32xf32, #tpu.memory_space<any>>
    %c29_i32_89 = arith.constant 29 : i32
    %c0_i32_90 = arith.constant 0 : i32
    %149 = tpu.memref_slice %arg4[%c29_i32_89, %c0_i32_90] : memref<40x32xf32, #tpu.memory_space<vmem>> -> memref<1x32xf32, #tpu.memory_space<vmem>>
    %150 = tpu.memref_slice %arg5[%c29_i32] : memref<32x!tpu.dma_semaphore, #tpu.memory_space<semaphore_mem>> -> memref<1x!tpu.dma_semaphore, #tpu.memory_space<semaphore_mem>>
    %151 = tpu.memref_squeeze %150 : memref<1x!tpu.dma_semaphore, #tpu.memory_space<semaphore_mem>> -> memref<!tpu.dma_semaphore, #tpu.memory_space<semaphore_mem>>
    tpu.enqueue_dma source(%148 : memref<1x32xf32, #tpu.memory_space<any>>) target(%149 : memref<1x32xf32, #tpu.memory_space<vmem>>) target_semaphore(%151 : memref<!tpu.dma_semaphore, #tpu.memory_space<semaphore_mem>>)
    %c30 = arith.constant 30 : index
    %152 = memref.load %arg0[%c30] : memref<32xi32, #tpu.memory_space<smem>>
    %c30_i32 = arith.constant 30 : i32
    %c0_i32_91 = arith.constant 0 : i32
    %153 = tpu.memref_slice %arg1[%152, %c0_i32_91] : memref<50x32xf32, #tpu.memory_space<any>> -> memref<1x32xf32, #tpu.memory_space<any>>
    %c30_i32_92 = arith.constant 30 : i32
    %c0_i32_93 = arith.constant 0 : i32
    %154 = tpu.memref_slice %arg4[%c30_i32_92, %c0_i32_93] : memref<40x32xf32, #tpu.memory_space<vmem>> -> memref<1x32xf32, #tpu.memory_space<vmem>>
    %155 = tpu.memref_slice %arg5[%c30_i32] : memref<32x!tpu.dma_semaphore, #tpu.memory_space<semaphore_mem>> -> memref<1x!tpu.dma_semaphore, #tpu.memory_space<semaphore_mem>>
    %156 = tpu.memref_squeeze %155 : memref<1x!tpu.dma_semaphore, #tpu.memory_space<semaphore_mem>> -> memref<!tpu.dma_semaphore, #tpu.memory_space<semaphore_mem>>
    tpu.enqueue_dma source(%153 : memref<1x32xf32, #tpu.memory_space<any>>) target(%154 : memref<1x32xf32, #tpu.memory_space<vmem>>) target_semaphore(%156 : memref<!tpu.dma_semaphore, #tpu.memory_space<semaphore_mem>>)
    %c31 = arith.constant 31 : index
    %157 = memref.load %arg0[%c31] : memref<32xi32, #tpu.memory_space<smem>>
    %c31_i32 = arith.constant 31 : i32
    %c0_i32_94 = arith.constant 0 : i32
    %158 = tpu.memref_slice %arg1[%157, %c0_i32_94] : memref<50x32xf32, #tpu.memory_space<any>> -> memref<1x32xf32, #tpu.memory_space<any>>
    %c31_i32_95 = arith.constant 31 : i32
    %c0_i32_96 = arith.constant 0 : i32
    %159 = tpu.memref_slice %arg4[%c31_i32_95, %c0_i32_96] : memref<40x32xf32, #tpu.memory_space<vmem>> -> memref<1x32xf32, #tpu.memory_space<vmem>>
    %160 = tpu.memref_slice %arg5[%c31_i32] : memref<32x!tpu.dma_semaphore, #tpu.memory_space<semaphore_mem>> -> memref<1x!tpu.dma_semaphore, #tpu.memory_space<semaphore_mem>>
    %161 = tpu.memref_squeeze %160 : memref<1x!tpu.dma_semaphore, #tpu.memory_space<semaphore_mem>> -> memref<!tpu.dma_semaphore, #tpu.memory_space<semaphore_mem>>
    tpu.enqueue_dma source(%158 : memref<1x32xf32, #tpu.memory_space<any>>) target(%159 : memref<1x32xf32, #tpu.memory_space<vmem>>) target_semaphore(%161 : memref<!tpu.dma_semaphore, #tpu.memory_space<semaphore_mem>>)
    %c0_97 = arith.constant 0 : index
    %162 = memref.load %arg0[%c0_97] : memref<32xi32, #tpu.memory_space<smem>>
    %c0_i32_98 = arith.constant 0 : i32
    %c0_i32_99 = arith.constant 0 : i32
    %163 = tpu.memref_slice %arg1[%162, %c0_i32_99] : memref<50x32xf32, #tpu.memory_space<any>> -> memref<1x32xf32, #tpu.memory_space<any>>
    %c0_i32_100 = arith.constant 0 : i32
    %c0_i32_101 = arith.constant 0 : i32
    %164 = tpu.memref_slice %arg4[%c0_i32_100, %c0_i32_101] : memref<40x32xf32, #tpu.memory_space<vmem>> -> memref<1x32xf32, #tpu.memory_space<vmem>>
    %165 = tpu.memref_slice %arg5[%c0_i32_98] : memref<32x!tpu.dma_semaphore, #tpu.memory_space<semaphore_mem>> -> memref<1x!tpu.dma_semaphore, #tpu.memory_space<semaphore_mem>>
    %166 = tpu.memref_squeeze %165 : memref<1x!tpu.dma_semaphore, #tpu.memory_space<semaphore_mem>> -> memref<!tpu.dma_semaphore, #tpu.memory_space<semaphore_mem>>
    tpu.wait_dma2 semaphore(%166 : memref<!tpu.dma_semaphore, #tpu.memory_space<semaphore_mem>>) src(%163 : memref<1x32xf32, #tpu.memory_space<any>>) dst(%164 : memref<1x32xf32, #tpu.memory_space<vmem>>)
    %c1_102 = arith.constant 1 : index
    %167 = memref.load %arg0[%c1_102] : memref<32xi32, #tpu.memory_space<smem>>
    %c1_i32_103 = arith.constant 1 : i32
    %c0_i32_104 = arith.constant 0 : i32
    %168 = tpu.memref_slice %arg1[%167, %c0_i32_104] : memref<50x32xf32, #tpu.memory_space<any>> -> memref<1x32xf32, #tpu.memory_space<any>>
    %c1_i32_105 = arith.constant 1 : i32
    %c0_i32_106 = arith.constant 0 : i32
    %169 = tpu.memref_slice %arg4[%c1_i32_105, %c0_i32_106] : memref<40x32xf32, #tpu.memory_space<vmem>> -> memref<1x32xf32, #tpu.memory_space<vmem>>
    %170 = tpu.memref_slice %arg5[%c1_i32_103] : memref<32x!tpu.dma_semaphore, #tpu.memory_space<semaphore_mem>> -> memref<1x!tpu.dma_semaphore, #tpu.memory_space<semaphore_mem>>
    %171 = tpu.memref_squeeze %170 : memref<1x!tpu.dma_semaphore, #tpu.memory_space<semaphore_mem>> -> memref<!tpu.dma_semaphore, #tpu.memory_space<semaphore_mem>>
    tpu.wait_dma2 semaphore(%171 : memref<!tpu.dma_semaphore, #tpu.memory_space<semaphore_mem>>) src(%168 : memref<1x32xf32, #tpu.memory_space<any>>) dst(%169 : memref<1x32xf32, #tpu.memory_space<vmem>>)
    %c2_107 = arith.constant 2 : index
    %172 = memref.load %arg0[%c2_107] : memref<32xi32, #tpu.memory_space<smem>>
    %c2_i32_108 = arith.constant 2 : i32
    %c0_i32_109 = arith.constant 0 : i32
    %173 = tpu.memref_slice %arg1[%172, %c0_i32_109] : memref<50x32xf32, #tpu.memory_space<any>> -> memref<1x32xf32, #tpu.memory_space<any>>
    %c2_i32_110 = arith.constant 2 : i32
    %c0_i32_111 = arith.constant 0 : i32
    %174 = tpu.memref_slice %arg4[%c2_i32_110, %c0_i32_111] : memref<40x32xf32, #tpu.memory_space<vmem>> -> memref<1x32xf32, #tpu.memory_space<vmem>>
    %175 = tpu.memref_slice %arg5[%c2_i32_108] : memref<32x!tpu.dma_semaphore, #tpu.memory_space<semaphore_mem>> -> memref<1x!tpu.dma_semaphore, #tpu.memory_space<semaphore_mem>>
    %176 = tpu.memref_squeeze %175 : memref<1x!tpu.dma_semaphore, #tpu.memory_space<semaphore_mem>> -> memref<!tpu.dma_semaphore, #tpu.memory_space<semaphore_mem>>
    tpu.wait_dma2 semaphore(%176 : memref<!tpu.dma_semaphore, #tpu.memory_space<semaphore_mem>>) src(%173 : memref<1x32xf32, #tpu.memory_space<any>>) dst(%174 : memref<1x32xf32, #tpu.memory_space<vmem>>)
    %c3_112 = arith.constant 3 : index
    %177 = memref.load %arg0[%c3_112] : memref<32xi32, #tpu.memory_space<smem>>
    %c3_i32_113 = arith.constant 3 : i32
    %c0_i32_114 = arith.constant 0 : i32
    %178 = tpu.memref_slice %arg1[%177, %c0_i32_114] : memref<50x32xf32, #tpu.memory_space<any>> -> memref<1x32xf32, #tpu.memory_space<any>>
    %c3_i32_115 = arith.constant 3 : i32
    %c0_i32_116 = arith.constant 0 : i32
    %179 = tpu.memref_slice %arg4[%c3_i32_115, %c0_i32_116] : memref<40x32xf32, #tpu.memory_space<vmem>> -> memref<1x32xf32, #tpu.memory_space<vmem>>
    %180 = tpu.memref_slice %arg5[%c3_i32_113] : memref<32x!tpu.dma_semaphore, #tpu.memory_space<semaphore_mem>> -> memref<1x!tpu.dma_semaphore, #tpu.memory_space<semaphore_mem>>
    %181 = tpu.memref_squeeze %180 : memref<1x!tpu.dma_semaphore, #tpu.memory_space<semaphore_mem>> -> memref<!tpu.dma_semaphore, #tpu.memory_space<semaphore_mem>>
    tpu.wait_dma2 semaphore(%181 : memref<!tpu.dma_semaphore, #tpu.memory_space<semaphore_mem>>) src(%178 : memref<1x32xf32, #tpu.memory_space<any>>) dst(%179 : memref<1x32xf32, #tpu.memory_space<vmem>>)
    %c4_117 = arith.constant 4 : index
    %182 = memref.load %arg0[%c4_117] : memref<32xi32, #tpu.memory_space<smem>>
    %c4_i32_118 = arith.constant 4 : i32
    %c0_i32_119 = arith.constant 0 : i32
    %183 = tpu.memref_slice %arg1[%182, %c0_i32_119] : memref<50x32xf32, #tpu.memory_space<any>> -> memref<1x32xf32, #tpu.memory_space<any>>
    %c4_i32_120 = arith.constant 4 : i32
    %c0_i32_121 = arith.constant 0 : i32
    %184 = tpu.memref_slice %arg4[%c4_i32_120, %c0_i32_121] : memref<40x32xf32, #tpu.memory_space<vmem>> -> memref<1x32xf32, #tpu.memory_space<vmem>>
    %185 = tpu.memref_slice %arg5[%c4_i32_118] : memref<32x!tpu.dma_semaphore, #tpu.memory_space<semaphore_mem>> -> memref<1x!tpu.dma_semaphore, #tpu.memory_space<semaphore_mem>>
    %186 = tpu.memref_squeeze %185 : memref<1x!tpu.dma_semaphore, #tpu.memory_space<semaphore_mem>> -> memref<!tpu.dma_semaphore, #tpu.memory_space<semaphore_mem>>
    tpu.wait_dma2 semaphore(%186 : memref<!tpu.dma_semaphore, #tpu.memory_space<semaphore_mem>>) src(%183 : memref<1x32xf32, #tpu.memory_space<any>>) dst(%184 : memref<1x32xf32, #tpu.memory_space<vmem>>)
    %c5_122 = arith.constant 5 : index
    %187 = memref.load %arg0[%c5_122] : memref<32xi32, #tpu.memory_space<smem>>
    %c5_i32_123 = arith.constant 5 : i32
    %c0_i32_124 = arith.constant 0 : i32
    %188 = tpu.memref_slice %arg1[%187, %c0_i32_124] : memref<50x32xf32, #tpu.memory_space<any>> -> memref<1x32xf32, #tpu.memory_space<any>>
    %c5_i32_125 = arith.constant 5 : i32
    %c0_i32_126 = arith.constant 0 : i32
    %189 = tpu.memref_slice %arg4[%c5_i32_125, %c0_i32_126] : memref<40x32xf32, #tpu.memory_space<vmem>> -> memref<1x32xf32, #tpu.memory_space<vmem>>
    %190 = tpu.memref_slice %arg5[%c5_i32_123] : memref<32x!tpu.dma_semaphore, #tpu.memory_space<semaphore_mem>> -> memref<1x!tpu.dma_semaphore, #tpu.memory_space<semaphore_mem>>
    %191 = tpu.memref_squeeze %190 : memref<1x!tpu.dma_semaphore, #tpu.memory_space<semaphore_mem>> -> memref<!tpu.dma_semaphore, #tpu.memory_space<semaphore_mem>>
    tpu.wait_dma2 semaphore(%191 : memref<!tpu.dma_semaphore, #tpu.memory_space<semaphore_mem>>) src(%188 : memref<1x32xf32, #tpu.memory_space<any>>) dst(%189 : memref<1x32xf32, #tpu.memory_space<vmem>>)
    %c6_127 = arith.constant 6 : index
    %192 = memref.load %arg0[%c6_127] : memref<32xi32, #tpu.memory_space<smem>>
    %c6_i32_128 = arith.constant 6 : i32
    %c0_i32_129 = arith.constant 0 : i32
    %193 = tpu.memref_slice %arg1[%192, %c0_i32_129] : memref<50x32xf32, #tpu.memory_space<any>> -> memref<1x32xf32, #tpu.memory_space<any>>
    %c6_i32_130 = arith.constant 6 : i32
    %c0_i32_131 = arith.constant 0 : i32
    %194 = tpu.memref_slice %arg4[%c6_i32_130, %c0_i32_131] : memref<40x32xf32, #tpu.memory_space<vmem>> -> memref<1x32xf32, #tpu.memory_space<vmem>>
    %195 = tpu.memref_slice %arg5[%c6_i32_128] : memref<32x!tpu.dma_semaphore, #tpu.memory_space<semaphore_mem>> -> memref<1x!tpu.dma_semaphore, #tpu.memory_space<semaphore_mem>>
    %196 = tpu.memref_squeeze %195 : memref<1x!tpu.dma_semaphore, #tpu.memory_space<semaphore_mem>> -> memref<!tpu.dma_semaphore, #tpu.memory_space<semaphore_mem>>
    tpu.wait_dma2 semaphore(%196 : memref<!tpu.dma_semaphore, #tpu.memory_space<semaphore_mem>>) src(%193 : memref<1x32xf32, #tpu.memory_space<any>>) dst(%194 : memref<1x32xf32, #tpu.memory_space<vmem>>)
    %c7_132 = arith.constant 7 : index
    %197 = memref.load %arg0[%c7_132] : memref<32xi32, #tpu.memory_space<smem>>
    %c7_i32_133 = arith.constant 7 : i32
    %c0_i32_134 = arith.constant 0 : i32
    %198 = tpu.memref_slice %arg1[%197, %c0_i32_134] : memref<50x32xf32, #tpu.memory_space<any>> -> memref<1x32xf32, #tpu.memory_space<any>>
    %c7_i32_135 = arith.constant 7 : i32
    %c0_i32_136 = arith.constant 0 : i32
    %199 = tpu.memref_slice %arg4[%c7_i32_135, %c0_i32_136] : memref<40x32xf32, #tpu.memory_space<vmem>> -> memref<1x32xf32, #tpu.memory_space<vmem>>
    %200 = tpu.memref_slice %arg5[%c7_i32_133] : memref<32x!tpu.dma_semaphore, #tpu.memory_space<semaphore_mem>> -> memref<1x!tpu.dma_semaphore, #tpu.memory_space<semaphore_mem>>
    %201 = tpu.memref_squeeze %200 : memref<1x!tpu.dma_semaphore, #tpu.memory_space<semaphore_mem>> -> memref<!tpu.dma_semaphore, #tpu.memory_space<semaphore_mem>>
    tpu.wait_dma2 semaphore(%201 : memref<!tpu.dma_semaphore, #tpu.memory_space<semaphore_mem>>) src(%198 : memref<1x32xf32, #tpu.memory_space<any>>) dst(%199 : memref<1x32xf32, #tpu.memory_space<vmem>>)
    %c8_137 = arith.constant 8 : index
    %202 = memref.load %arg0[%c8_137] : memref<32xi32, #tpu.memory_space<smem>>
    %c8_i32_138 = arith.constant 8 : i32
    %c0_i32_139 = arith.constant 0 : i32
    %203 = tpu.memref_slice %arg1[%202, %c0_i32_139] : memref<50x32xf32, #tpu.memory_space<any>> -> memref<1x32xf32, #tpu.memory_space<any>>
    %c8_i32_140 = arith.constant 8 : i32
    %c0_i32_141 = arith.constant 0 : i32
    %204 = tpu.memref_slice %arg4[%c8_i32_140, %c0_i32_141] : memref<40x32xf32, #tpu.memory_space<vmem>> -> memref<1x32xf32, #tpu.memory_space<vmem>>
    %205 = tpu.memref_slice %arg5[%c8_i32_138] : memref<32x!tpu.dma_semaphore, #tpu.memory_space<semaphore_mem>> -> memref<1x!tpu.dma_semaphore, #tpu.memory_space<semaphore_mem>>
    %206 = tpu.memref_squeeze %205 : memref<1x!tpu.dma_semaphore, #tpu.memory_space<semaphore_mem>> -> memref<!tpu.dma_semaphore, #tpu.memory_space<semaphore_mem>>
    tpu.wait_dma2 semaphore(%206 : memref<!tpu.dma_semaphore, #tpu.memory_space<semaphore_mem>>) src(%203 : memref<1x32xf32, #tpu.memory_space<any>>) dst(%204 : memref<1x32xf32, #tpu.memory_space<vmem>>)
    %c9_142 = arith.constant 9 : index
    %207 = memref.load %arg0[%c9_142] : memref<32xi32, #tpu.memory_space<smem>>
    %c9_i32_143 = arith.constant 9 : i32
    %c0_i32_144 = arith.constant 0 : i32
    %208 = tpu.memref_slice %arg1[%207, %c0_i32_144] : memref<50x32xf32, #tpu.memory_space<any>> -> memref<1x32xf32, #tpu.memory_space<any>>
    %c9_i32_145 = arith.constant 9 : i32
    %c0_i32_146 = arith.constant 0 : i32
    %209 = tpu.memref_slice %arg4[%c9_i32_145, %c0_i32_146] : memref<40x32xf32, #tpu.memory_space<vmem>> -> memref<1x32xf32, #tpu.memory_space<vmem>>
    %210 = tpu.memref_slice %arg5[%c9_i32_143] : memref<32x!tpu.dma_semaphore, #tpu.memory_space<semaphore_mem>> -> memref<1x!tpu.dma_semaphore, #tpu.memory_space<semaphore_mem>>
    %211 = tpu.memref_squeeze %210 : memref<1x!tpu.dma_semaphore, #tpu.memory_space<semaphore_mem>> -> memref<!tpu.dma_semaphore, #tpu.memory_space<semaphore_mem>>
    tpu.wait_dma2 semaphore(%211 : memref<!tpu.dma_semaphore, #tpu.memory_space<semaphore_mem>>) src(%208 : memref<1x32xf32, #tpu.memory_space<any>>) dst(%209 : memref<1x32xf32, #tpu.memory_space<vmem>>)
    %c10_147 = arith.constant 10 : index
    %212 = memref.load %arg0[%c10_147] : memref<32xi32, #tpu.memory_space<smem>>
    %c10_i32_148 = arith.constant 10 : i32
    %c0_i32_149 = arith.constant 0 : i32
    %213 = tpu.memref_slice %arg1[%212, %c0_i32_149] : memref<50x32xf32, #tpu.memory_space<any>> -> memref<1x32xf32, #tpu.memory_space<any>>
    %c10_i32_150 = arith.constant 10 : i32
    %c0_i32_151 = arith.constant 0 : i32
    %214 = tpu.memref_slice %arg4[%c10_i32_150, %c0_i32_151] : memref<40x32xf32, #tpu.memory_space<vmem>> -> memref<1x32xf32, #tpu.memory_space<vmem>>
    %215 = tpu.memref_slice %arg5[%c10_i32_148] : memref<32x!tpu.dma_semaphore, #tpu.memory_space<semaphore_mem>> -> memref<1x!tpu.dma_semaphore, #tpu.memory_space<semaphore_mem>>
    %216 = tpu.memref_squeeze %215 : memref<1x!tpu.dma_semaphore, #tpu.memory_space<semaphore_mem>> -> memref<!tpu.dma_semaphore, #tpu.memory_space<semaphore_mem>>
    tpu.wait_dma2 semaphore(%216 : memref<!tpu.dma_semaphore, #tpu.memory_space<semaphore_mem>>) src(%213 : memref<1x32xf32, #tpu.memory_space<any>>) dst(%214 : memref<1x32xf32, #tpu.memory_space<vmem>>)
    %c11_152 = arith.constant 11 : index
    %217 = memref.load %arg0[%c11_152] : memref<32xi32, #tpu.memory_space<smem>>
    %c11_i32_153 = arith.constant 11 : i32
    %c0_i32_154 = arith.constant 0 : i32
    %218 = tpu.memref_slice %arg1[%217, %c0_i32_154] : memref<50x32xf32, #tpu.memory_space<any>> -> memref<1x32xf32, #tpu.memory_space<any>>
    %c11_i32_155 = arith.constant 11 : i32
    %c0_i32_156 = arith.constant 0 : i32
    %219 = tpu.memref_slice %arg4[%c11_i32_155, %c0_i32_156] : memref<40x32xf32, #tpu.memory_space<vmem>> -> memref<1x32xf32, #tpu.memory_space<vmem>>
    %220 = tpu.memref_slice %arg5[%c11_i32_153] : memref<32x!tpu.dma_semaphore, #tpu.memory_space<semaphore_mem>> -> memref<1x!tpu.dma_semaphore, #tpu.memory_space<semaphore_mem>>
    %221 = tpu.memref_squeeze %220 : memref<1x!tpu.dma_semaphore, #tpu.memory_space<semaphore_mem>> -> memref<!tpu.dma_semaphore, #tpu.memory_space<semaphore_mem>>
    tpu.wait_dma2 semaphore(%221 : memref<!tpu.dma_semaphore, #tpu.memory_space<semaphore_mem>>) src(%218 : memref<1x32xf32, #tpu.memory_space<any>>) dst(%219 : memref<1x32xf32, #tpu.memory_space<vmem>>)
    %c12_157 = arith.constant 12 : index
    %222 = memref.load %arg0[%c12_157] : memref<32xi32, #tpu.memory_space<smem>>
    %c12_i32_158 = arith.constant 12 : i32
    %c0_i32_159 = arith.constant 0 : i32
    %223 = tpu.memref_slice %arg1[%222, %c0_i32_159] : memref<50x32xf32, #tpu.memory_space<any>> -> memref<1x32xf32, #tpu.memory_space<any>>
    %c12_i32_160 = arith.constant 12 : i32
    %c0_i32_161 = arith.constant 0 : i32
    %224 = tpu.memref_slice %arg4[%c12_i32_160, %c0_i32_161] : memref<40x32xf32, #tpu.memory_space<vmem>> -> memref<1x32xf32, #tpu.memory_space<vmem>>
    %225 = tpu.memref_slice %arg5[%c12_i32_158] : memref<32x!tpu.dma_semaphore, #tpu.memory_space<semaphore_mem>> -> memref<1x!tpu.dma_semaphore, #tpu.memory_space<semaphore_mem>>
    %226 = tpu.memref_squeeze %225 : memref<1x!tpu.dma_semaphore, #tpu.memory_space<semaphore_mem>> -> memref<!tpu.dma_semaphore, #tpu.memory_space<semaphore_mem>>
    tpu.wait_dma2 semaphore(%226 : memref<!tpu.dma_semaphore, #tpu.memory_space<semaphore_mem>>) src(%223 : memref<1x32xf32, #tpu.memory_space<any>>) dst(%224 : memref<1x32xf32, #tpu.memory_space<vmem>>)
    %c13_162 = arith.constant 13 : index
    %227 = memref.load %arg0[%c13_162] : memref<32xi32, #tpu.memory_space<smem>>
    %c13_i32_163 = arith.constant 13 : i32
    %c0_i32_164 = arith.constant 0 : i32
    %228 = tpu.memref_slice %arg1[%227, %c0_i32_164] : memref<50x32xf32, #tpu.memory_space<any>> -> memref<1x32xf32, #tpu.memory_space<any>>
    %c13_i32_165 = arith.constant 13 : i32
    %c0_i32_166 = arith.constant 0 : i32
    %229 = tpu.memref_slice %arg4[%c13_i32_165, %c0_i32_166] : memref<40x32xf32, #tpu.memory_space<vmem>> -> memref<1x32xf32, #tpu.memory_space<vmem>>
    %230 = tpu.memref_slice %arg5[%c13_i32_163] : memref<32x!tpu.dma_semaphore, #tpu.memory_space<semaphore_mem>> -> memref<1x!tpu.dma_semaphore, #tpu.memory_space<semaphore_mem>>
    %231 = tpu.memref_squeeze %230 : memref<1x!tpu.dma_semaphore, #tpu.memory_space<semaphore_mem>> -> memref<!tpu.dma_semaphore, #tpu.memory_space<semaphore_mem>>
    tpu.wait_dma2 semaphore(%231 : memref<!tpu.dma_semaphore, #tpu.memory_space<semaphore_mem>>) src(%228 : memref<1x32xf32, #tpu.memory_space<any>>) dst(%229 : memref<1x32xf32, #tpu.memory_space<vmem>>)
    %c14_167 = arith.constant 14 : index
    %232 = memref.load %arg0[%c14_167] : memref<32xi32, #tpu.memory_space<smem>>
    %c14_i32_168 = arith.constant 14 : i32
    %c0_i32_169 = arith.constant 0 : i32
    %233 = tpu.memref_slice %arg1[%232, %c0_i32_169] : memref<50x32xf32, #tpu.memory_space<any>> -> memref<1x32xf32, #tpu.memory_space<any>>
    %c14_i32_170 = arith.constant 14 : i32
    %c0_i32_171 = arith.constant 0 : i32
    %234 = tpu.memref_slice %arg4[%c14_i32_170, %c0_i32_171] : memref<40x32xf32, #tpu.memory_space<vmem>> -> memref<1x32xf32, #tpu.memory_space<vmem>>
    %235 = tpu.memref_slice %arg5[%c14_i32_168] : memref<32x!tpu.dma_semaphore, #tpu.memory_space<semaphore_mem>> -> memref<1x!tpu.dma_semaphore, #tpu.memory_space<semaphore_mem>>
    %236 = tpu.memref_squeeze %235 : memref<1x!tpu.dma_semaphore, #tpu.memory_space<semaphore_mem>> -> memref<!tpu.dma_semaphore, #tpu.memory_space<semaphore_mem>>
    tpu.wait_dma2 semaphore(%236 : memref<!tpu.dma_semaphore, #tpu.memory_space<semaphore_mem>>) src(%233 : memref<1x32xf32, #tpu.memory_space<any>>) dst(%234 : memref<1x32xf32, #tpu.memory_space<vmem>>)
    %c15_172 = arith.constant 15 : index
    %237 = memref.load %arg0[%c15_172] : memref<32xi32, #tpu.memory_space<smem>>
    %c15_i32_173 = arith.constant 15 : i32
    %c0_i32_174 = arith.constant 0 : i32
    %238 = tpu.memref_slice %arg1[%237, %c0_i32_174] : memref<50x32xf32, #tpu.memory_space<any>> -> memref<1x32xf32, #tpu.memory_space<any>>
    %c15_i32_175 = arith.constant 15 : i32
    %c0_i32_176 = arith.constant 0 : i32
    %239 = tpu.memref_slice %arg4[%c15_i32_175, %c0_i32_176] : memref<40x32xf32, #tpu.memory_space<vmem>> -> memref<1x32xf32, #tpu.memory_space<vmem>>
    %240 = tpu.memref_slice %arg5[%c15_i32_173] : memref<32x!tpu.dma_semaphore, #tpu.memory_space<semaphore_mem>> -> memref<1x!tpu.dma_semaphore, #tpu.memory_space<semaphore_mem>>
    %241 = tpu.memref_squeeze %240 : memref<1x!tpu.dma_semaphore, #tpu.memory_space<semaphore_mem>> -> memref<!tpu.dma_semaphore, #tpu.memory_space<semaphore_mem>>
    tpu.wait_dma2 semaphore(%241 : memref<!tpu.dma_semaphore, #tpu.memory_space<semaphore_mem>>) src(%238 : memref<1x32xf32, #tpu.memory_space<any>>) dst(%239 : memref<1x32xf32, #tpu.memory_space<vmem>>)
    %c16_177 = arith.constant 16 : index
    %242 = memref.load %arg0[%c16_177] : memref<32xi32, #tpu.memory_space<smem>>
    %c16_i32_178 = arith.constant 16 : i32
    %c0_i32_179 = arith.constant 0 : i32
    %243 = tpu.memref_slice %arg1[%242, %c0_i32_179] : memref<50x32xf32, #tpu.memory_space<any>> -> memref<1x32xf32, #tpu.memory_space<any>>
    %c16_i32_180 = arith.constant 16 : i32
    %c0_i32_181 = arith.constant 0 : i32
    %244 = tpu.memref_slice %arg4[%c16_i32_180, %c0_i32_181] : memref<40x32xf32, #tpu.memory_space<vmem>> -> memref<1x32xf32, #tpu.memory_space<vmem>>
    %245 = tpu.memref_slice %arg5[%c16_i32_178] : memref<32x!tpu.dma_semaphore, #tpu.memory_space<semaphore_mem>> -> memref<1x!tpu.dma_semaphore, #tpu.memory_space<semaphore_mem>>
    %246 = tpu.memref_squeeze %245 : memref<1x!tpu.dma_semaphore, #tpu.memory_space<semaphore_mem>> -> memref<!tpu.dma_semaphore, #tpu.memory_space<semaphore_mem>>
    tpu.wait_dma2 semaphore(%246 : memref<!tpu.dma_semaphore, #tpu.memory_space<semaphore_mem>>) src(%243 : memref<1x32xf32, #tpu.memory_space<any>>) dst(%244 : memref<1x32xf32, #tpu.memory_space<vmem>>)
    %c17_182 = arith.constant 17 : index
    %247 = memref.load %arg0[%c17_182] : memref<32xi32, #tpu.memory_space<smem>>
    %c17_i32_183 = arith.constant 17 : i32
    %c0_i32_184 = arith.constant 0 : i32
    %248 = tpu.memref_slice %arg1[%247, %c0_i32_184] : memref<50x32xf32, #tpu.memory_space<any>> -> memref<1x32xf32, #tpu.memory_space<any>>
    %c17_i32_185 = arith.constant 17 : i32
    %c0_i32_186 = arith.constant 0 : i32
    %249 = tpu.memref_slice %arg4[%c17_i32_185, %c0_i32_186] : memref<40x32xf32, #tpu.memory_space<vmem>> -> memref<1x32xf32, #tpu.memory_space<vmem>>
    %250 = tpu.memref_slice %arg5[%c17_i32_183] : memref<32x!tpu.dma_semaphore, #tpu.memory_space<semaphore_mem>> -> memref<1x!tpu.dma_semaphore, #tpu.memory_space<semaphore_mem>>
    %251 = tpu.memref_squeeze %250 : memref<1x!tpu.dma_semaphore, #tpu.memory_space<semaphore_mem>> -> memref<!tpu.dma_semaphore, #tpu.memory_space<semaphore_mem>>
    tpu.wait_dma2 semaphore(%251 : memref<!tpu.dma_semaphore, #tpu.memory_space<semaphore_mem>>) src(%248 : memref<1x32xf32, #tpu.memory_space<any>>) dst(%249 : memref<1x32xf32, #tpu.memory_space<vmem>>)
    %c18_187 = arith.constant 18 : index
    %252 = memref.load %arg0[%c18_187] : memref<32xi32, #tpu.memory_space<smem>>
    %c18_i32_188 = arith.constant 18 : i32
    %c0_i32_189 = arith.constant 0 : i32
    %253 = tpu.memref_slice %arg1[%252, %c0_i32_189] : memref<50x32xf32, #tpu.memory_space<any>> -> memref<1x32xf32, #tpu.memory_space<any>>
    %c18_i32_190 = arith.constant 18 : i32
    %c0_i32_191 = arith.constant 0 : i32
    %254 = tpu.memref_slice %arg4[%c18_i32_190, %c0_i32_191] : memref<40x32xf32, #tpu.memory_space<vmem>> -> memref<1x32xf32, #tpu.memory_space<vmem>>
    %255 = tpu.memref_slice %arg5[%c18_i32_188] : memref<32x!tpu.dma_semaphore, #tpu.memory_space<semaphore_mem>> -> memref<1x!tpu.dma_semaphore, #tpu.memory_space<semaphore_mem>>
    %256 = tpu.memref_squeeze %255 : memref<1x!tpu.dma_semaphore, #tpu.memory_space<semaphore_mem>> -> memref<!tpu.dma_semaphore, #tpu.memory_space<semaphore_mem>>
    tpu.wait_dma2 semaphore(%256 : memref<!tpu.dma_semaphore, #tpu.memory_space<semaphore_mem>>) src(%253 : memref<1x32xf32, #tpu.memory_space<any>>) dst(%254 : memref<1x32xf32, #tpu.memory_space<vmem>>)
    %c19_192 = arith.constant 19 : index
    %257 = memref.load %arg0[%c19_192] : memref<32xi32, #tpu.memory_space<smem>>
    %c19_i32_193 = arith.constant 19 : i32
    %c0_i32_194 = arith.constant 0 : i32
    %258 = tpu.memref_slice %arg1[%257, %c0_i32_194] : memref<50x32xf32, #tpu.memory_space<any>> -> memref<1x32xf32, #tpu.memory_space<any>>
    %c19_i32_195 = arith.constant 19 : i32
    %c0_i32_196 = arith.constant 0 : i32
    %259 = tpu.memref_slice %arg4[%c19_i32_195, %c0_i32_196] : memref<40x32xf32, #tpu.memory_space<vmem>> -> memref<1x32xf32, #tpu.memory_space<vmem>>
    %260 = tpu.memref_slice %arg5[%c19_i32_193] : memref<32x!tpu.dma_semaphore, #tpu.memory_space<semaphore_mem>> -> memref<1x!tpu.dma_semaphore, #tpu.memory_space<semaphore_mem>>
    %261 = tpu.memref_squeeze %260 : memref<1x!tpu.dma_semaphore, #tpu.memory_space<semaphore_mem>> -> memref<!tpu.dma_semaphore, #tpu.memory_space<semaphore_mem>>
    tpu.wait_dma2 semaphore(%261 : memref<!tpu.dma_semaphore, #tpu.memory_space<semaphore_mem>>) src(%258 : memref<1x32xf32, #tpu.memory_space<any>>) dst(%259 : memref<1x32xf32, #tpu.memory_space<vmem>>)
    %c20_197 = arith.constant 20 : index
    %262 = memref.load %arg0[%c20_197] : memref<32xi32, #tpu.memory_space<smem>>
    %c20_i32_198 = arith.constant 20 : i32
    %c0_i32_199 = arith.constant 0 : i32
    %263 = tpu.memref_slice %arg1[%262, %c0_i32_199] : memref<50x32xf32, #tpu.memory_space<any>> -> memref<1x32xf32, #tpu.memory_space<any>>
    %c20_i32_200 = arith.constant 20 : i32
    %c0_i32_201 = arith.constant 0 : i32
    %264 = tpu.memref_slice %arg4[%c20_i32_200, %c0_i32_201] : memref<40x32xf32, #tpu.memory_space<vmem>> -> memref<1x32xf32, #tpu.memory_space<vmem>>
    %265 = tpu.memref_slice %arg5[%c20_i32_198] : memref<32x!tpu.dma_semaphore, #tpu.memory_space<semaphore_mem>> -> memref<1x!tpu.dma_semaphore, #tpu.memory_space<semaphore_mem>>
    %266 = tpu.memref_squeeze %265 : memref<1x!tpu.dma_semaphore, #tpu.memory_space<semaphore_mem>> -> memref<!tpu.dma_semaphore, #tpu.memory_space<semaphore_mem>>
    tpu.wait_dma2 semaphore(%266 : memref<!tpu.dma_semaphore, #tpu.memory_space<semaphore_mem>>) src(%263 : memref<1x32xf32, #tpu.memory_space<any>>) dst(%264 : memref<1x32xf32, #tpu.memory_space<vmem>>)
    %c21_202 = arith.constant 21 : index
    %267 = memref.load %arg0[%c21_202] : memref<32xi32, #tpu.memory_space<smem>>
    %c21_i32_203 = arith.constant 21 : i32
    %c0_i32_204 = arith.constant 0 : i32
    %268 = tpu.memref_slice %arg1[%267, %c0_i32_204] : memref<50x32xf32, #tpu.memory_space<any>> -> memref<1x32xf32, #tpu.memory_space<any>>
    %c21_i32_205 = arith.constant 21 : i32
    %c0_i32_206 = arith.constant 0 : i32
    %269 = tpu.memref_slice %arg4[%c21_i32_205, %c0_i32_206] : memref<40x32xf32, #tpu.memory_space<vmem>> -> memref<1x32xf32, #tpu.memory_space<vmem>>
    %270 = tpu.memref_slice %arg5[%c21_i32_203] : memref<32x!tpu.dma_semaphore, #tpu.memory_space<semaphore_mem>> -> memref<1x!tpu.dma_semaphore, #tpu.memory_space<semaphore_mem>>
    %271 = tpu.memref_squeeze %270 : memref<1x!tpu.dma_semaphore, #tpu.memory_space<semaphore_mem>> -> memref<!tpu.dma_semaphore, #tpu.memory_space<semaphore_mem>>
    tpu.wait_dma2 semaphore(%271 : memref<!tpu.dma_semaphore, #tpu.memory_space<semaphore_mem>>) src(%268 : memref<1x32xf32, #tpu.memory_space<any>>) dst(%269 : memref<1x32xf32, #tpu.memory_space<vmem>>)
    %c22_207 = arith.constant 22 : index
    %272 = memref.load %arg0[%c22_207] : memref<32xi32, #tpu.memory_space<smem>>
    %c22_i32_208 = arith.constant 22 : i32
    %c0_i32_209 = arith.constant 0 : i32
    %273 = tpu.memref_slice %arg1[%272, %c0_i32_209] : memref<50x32xf32, #tpu.memory_space<any>> -> memref<1x32xf32, #tpu.memory_space<any>>
    %c22_i32_210 = arith.constant 22 : i32
    %c0_i32_211 = arith.constant 0 : i32
    %274 = tpu.memref_slice %arg4[%c22_i32_210, %c0_i32_211] : memref<40x32xf32, #tpu.memory_space<vmem>> -> memref<1x32xf32, #tpu.memory_space<vmem>>
    %275 = tpu.memref_slice %arg5[%c22_i32_208] : memref<32x!tpu.dma_semaphore, #tpu.memory_space<semaphore_mem>> -> memref<1x!tpu.dma_semaphore, #tpu.memory_space<semaphore_mem>>
    %276 = tpu.memref_squeeze %275 : memref<1x!tpu.dma_semaphore, #tpu.memory_space<semaphore_mem>> -> memref<!tpu.dma_semaphore, #tpu.memory_space<semaphore_mem>>
    tpu.wait_dma2 semaphore(%276 : memref<!tpu.dma_semaphore, #tpu.memory_space<semaphore_mem>>) src(%273 : memref<1x32xf32, #tpu.memory_space<any>>) dst(%274 : memref<1x32xf32, #tpu.memory_space<vmem>>)
    %c23_212 = arith.constant 23 : index
    %277 = memref.load %arg0[%c23_212] : memref<32xi32, #tpu.memory_space<smem>>
    %c23_i32_213 = arith.constant 23 : i32
    %c0_i32_214 = arith.constant 0 : i32
    %278 = tpu.memref_slice %arg1[%277, %c0_i32_214] : memref<50x32xf32, #tpu.memory_space<any>> -> memref<1x32xf32, #tpu.memory_space<any>>
    %c23_i32_215 = arith.constant 23 : i32
    %c0_i32_216 = arith.constant 0 : i32
    %279 = tpu.memref_slice %arg4[%c23_i32_215, %c0_i32_216] : memref<40x32xf32, #tpu.memory_space<vmem>> -> memref<1x32xf32, #tpu.memory_space<vmem>>
    %280 = tpu.memref_slice %arg5[%c23_i32_213] : memref<32x!tpu.dma_semaphore, #tpu.memory_space<semaphore_mem>> -> memref<1x!tpu.dma_semaphore, #tpu.memory_space<semaphore_mem>>
    %281 = tpu.memref_squeeze %280 : memref<1x!tpu.dma_semaphore, #tpu.memory_space<semaphore_mem>> -> memref<!tpu.dma_semaphore, #tpu.memory_space<semaphore_mem>>
    tpu.wait_dma2 semaphore(%281 : memref<!tpu.dma_semaphore, #tpu.memory_space<semaphore_mem>>) src(%278 : memref<1x32xf32, #tpu.memory_space<any>>) dst(%279 : memref<1x32xf32, #tpu.memory_space<vmem>>)
    %c24_217 = arith.constant 24 : index
    %282 = memref.load %arg0[%c24_217] : memref<32xi32, #tpu.memory_space<smem>>
    %c24_i32_218 = arith.constant 24 : i32
    %c0_i32_219 = arith.constant 0 : i32
    %283 = tpu.memref_slice %arg1[%282, %c0_i32_219] : memref<50x32xf32, #tpu.memory_space<any>> -> memref<1x32xf32, #tpu.memory_space<any>>
    %c24_i32_220 = arith.constant 24 : i32
    %c0_i32_221 = arith.constant 0 : i32
    %284 = tpu.memref_slice %arg4[%c24_i32_220, %c0_i32_221] : memref<40x32xf32, #tpu.memory_space<vmem>> -> memref<1x32xf32, #tpu.memory_space<vmem>>
    %285 = tpu.memref_slice %arg5[%c24_i32_218] : memref<32x!tpu.dma_semaphore, #tpu.memory_space<semaphore_mem>> -> memref<1x!tpu.dma_semaphore, #tpu.memory_space<semaphore_mem>>
    %286 = tpu.memref_squeeze %285 : memref<1x!tpu.dma_semaphore, #tpu.memory_space<semaphore_mem>> -> memref<!tpu.dma_semaphore, #tpu.memory_space<semaphore_mem>>
    tpu.wait_dma2 semaphore(%286 : memref<!tpu.dma_semaphore, #tpu.memory_space<semaphore_mem>>) src(%283 : memref<1x32xf32, #tpu.memory_space<any>>) dst(%284 : memref<1x32xf32, #tpu.memory_space<vmem>>)
    %c25_222 = arith.constant 25 : index
    %287 = memref.load %arg0[%c25_222] : memref<32xi32, #tpu.memory_space<smem>>
    %c25_i32_223 = arith.constant 25 : i32
    %c0_i32_224 = arith.constant 0 : i32
    %288 = tpu.memref_slice %arg1[%287, %c0_i32_224] : memref<50x32xf32, #tpu.memory_space<any>> -> memref<1x32xf32, #tpu.memory_space<any>>
    %c25_i32_225 = arith.constant 25 : i32
    %c0_i32_226 = arith.constant 0 : i32
    %289 = tpu.memref_slice %arg4[%c25_i32_225, %c0_i32_226] : memref<40x32xf32, #tpu.memory_space<vmem>> -> memref<1x32xf32, #tpu.memory_space<vmem>>
    %290 = tpu.memref_slice %arg5[%c25_i32_223] : memref<32x!tpu.dma_semaphore, #tpu.memory_space<semaphore_mem>> -> memref<1x!tpu.dma_semaphore, #tpu.memory_space<semaphore_mem>>
    %291 = tpu.memref_squeeze %290 : memref<1x!tpu.dma_semaphore, #tpu.memory_space<semaphore_mem>> -> memref<!tpu.dma_semaphore, #tpu.memory_space<semaphore_mem>>
    tpu.wait_dma2 semaphore(%291 : memref<!tpu.dma_semaphore, #tpu.memory_space<semaphore_mem>>) src(%288 : memref<1x32xf32, #tpu.memory_space<any>>) dst(%289 : memref<1x32xf32, #tpu.memory_space<vmem>>)
    %c26_227 = arith.constant 26 : index
    %292 = memref.load %arg0[%c26_227] : memref<32xi32, #tpu.memory_space<smem>>
    %c26_i32_228 = arith.constant 26 : i32
    %c0_i32_229 = arith.constant 0 : i32
    %293 = tpu.memref_slice %arg1[%292, %c0_i32_229] : memref<50x32xf32, #tpu.memory_space<any>> -> memref<1x32xf32, #tpu.memory_space<any>>
    %c26_i32_230 = arith.constant 26 : i32
    %c0_i32_231 = arith.constant 0 : i32
    %294 = tpu.memref_slice %arg4[%c26_i32_230, %c0_i32_231] : memref<40x32xf32, #tpu.memory_space<vmem>> -> memref<1x32xf32, #tpu.memory_space<vmem>>
    %295 = tpu.memref_slice %arg5[%c26_i32_228] : memref<32x!tpu.dma_semaphore, #tpu.memory_space<semaphore_mem>> -> memref<1x!tpu.dma_semaphore, #tpu.memory_space<semaphore_mem>>
    %296 = tpu.memref_squeeze %295 : memref<1x!tpu.dma_semaphore, #tpu.memory_space<semaphore_mem>> -> memref<!tpu.dma_semaphore, #tpu.memory_space<semaphore_mem>>
    tpu.wait_dma2 semaphore(%296 : memref<!tpu.dma_semaphore, #tpu.memory_space<semaphore_mem>>) src(%293 : memref<1x32xf32, #tpu.memory_space<any>>) dst(%294 : memref<1x32xf32, #tpu.memory_space<vmem>>)
    %c27_232 = arith.constant 27 : index
    %297 = memref.load %arg0[%c27_232] : memref<32xi32, #tpu.memory_space<smem>>
    %c27_i32_233 = arith.constant 27 : i32
    %c0_i32_234 = arith.constant 0 : i32
    %298 = tpu.memref_slice %arg1[%297, %c0_i32_234] : memref<50x32xf32, #tpu.memory_space<any>> -> memref<1x32xf32, #tpu.memory_space<any>>
    %c27_i32_235 = arith.constant 27 : i32
    %c0_i32_236 = arith.constant 0 : i32
    %299 = tpu.memref_slice %arg4[%c27_i32_235, %c0_i32_236] : memref<40x32xf32, #tpu.memory_space<vmem>> -> memref<1x32xf32, #tpu.memory_space<vmem>>
    %300 = tpu.memref_slice %arg5[%c27_i32_233] : memref<32x!tpu.dma_semaphore, #tpu.memory_space<semaphore_mem>> -> memref<1x!tpu.dma_semaphore, #tpu.memory_space<semaphore_mem>>
    %301 = tpu.memref_squeeze %300 : memref<1x!tpu.dma_semaphore, #tpu.memory_space<semaphore_mem>> -> memref<!tpu.dma_semaphore, #tpu.memory_space<semaphore_mem>>
    tpu.wait_dma2 semaphore(%301 : memref<!tpu.dma_semaphore, #tpu.memory_space<semaphore_mem>>) src(%298 : memref<1x32xf32, #tpu.memory_space<any>>) dst(%299 : memref<1x32xf32, #tpu.memory_space<vmem>>)
    %c28_237 = arith.constant 28 : index
    %302 = memref.load %arg0[%c28_237] : memref<32xi32, #tpu.memory_space<smem>>
    %c28_i32_238 = arith.constant 28 : i32
    %c0_i32_239 = arith.constant 0 : i32
    %303 = tpu.memref_slice %arg1[%302, %c0_i32_239] : memref<50x32xf32, #tpu.memory_space<any>> -> memref<1x32xf32, #tpu.memory_space<any>>
    %c28_i32_240 = arith.constant 28 : i32
    %c0_i32_241 = arith.constant 0 : i32
    %304 = tpu.memref_slice %arg4[%c28_i32_240, %c0_i32_241] : memref<40x32xf32, #tpu.memory_space<vmem>> -> memref<1x32xf32, #tpu.memory_space<vmem>>
    %305 = tpu.memref_slice %arg5[%c28_i32_238] : memref<32x!tpu.dma_semaphore, #tpu.memory_space<semaphore_mem>> -> memref<1x!tpu.dma_semaphore, #tpu.memory_space<semaphore_mem>>
    %306 = tpu.memref_squeeze %305 : memref<1x!tpu.dma_semaphore, #tpu.memory_space<semaphore_mem>> -> memref<!tpu.dma_semaphore, #tpu.memory_space<semaphore_mem>>
    tpu.wait_dma2 semaphore(%306 : memref<!tpu.dma_semaphore, #tpu.memory_space<semaphore_mem>>) src(%303 : memref<1x32xf32, #tpu.memory_space<any>>) dst(%304 : memref<1x32xf32, #tpu.memory_space<vmem>>)
    %c29_242 = arith.constant 29 : index
    %307 = memref.load %arg0[%c29_242] : memref<32xi32, #tpu.memory_space<smem>>
    %c29_i32_243 = arith.constant 29 : i32
    %c0_i32_244 = arith.constant 0 : i32
    %308 = tpu.memref_slice %arg1[%307, %c0_i32_244] : memref<50x32xf32, #tpu.memory_space<any>> -> memref<1x32xf32, #tpu.memory_space<any>>
    %c29_i32_245 = arith.constant 29 : i32
    %c0_i32_246 = arith.constant 0 : i32
    %309 = tpu.memref_slice %arg4[%c29_i32_245, %c0_i32_246] : memref<40x32xf32, #tpu.memory_space<vmem>> -> memref<1x32xf32, #tpu.memory_space<vmem>>
    %310 = tpu.memref_slice %arg5[%c29_i32_243] : memref<32x!tpu.dma_semaphore, #tpu.memory_space<semaphore_mem>> -> memref<1x!tpu.dma_semaphore, #tpu.memory_space<semaphore_mem>>
    %311 = tpu.memref_squeeze %310 : memref<1x!tpu.dma_semaphore, #tpu.memory_space<semaphore_mem>> -> memref<!tpu.dma_semaphore, #tpu.memory_space<semaphore_mem>>
    tpu.wait_dma2 semaphore(%311 : memref<!tpu.dma_semaphore, #tpu.memory_space<semaphore_mem>>) src(%308 : memref<1x32xf32, #tpu.memory_space<any>>) dst(%309 : memref<1x32xf32, #tpu.memory_space<vmem>>)
    %c30_247 = arith.constant 30 : index
    %312 = memref.load %arg0[%c30_247] : memref<32xi32, #tpu.memory_space<smem>>
    %c30_i32_248 = arith.constant 30 : i32
    %c0_i32_249 = arith.constant 0 : i32
    %313 = tpu.memref_slice %arg1[%312, %c0_i32_249] : memref<50x32xf32, #tpu.memory_space<any>> -> memref<1x32xf32, #tpu.memory_space<any>>
    %c30_i32_250 = arith.constant 30 : i32
    %c0_i32_251 = arith.constant 0 : i32
    %314 = tpu.memref_slice %arg4[%c30_i32_250, %c0_i32_251] : memref<40x32xf32, #tpu.memory_space<vmem>> -> memref<1x32xf32, #tpu.memory_space<vmem>>
    %315 = tpu.memref_slice %arg5[%c30_i32_248] : memref<32x!tpu.dma_semaphore, #tpu.memory_space<semaphore_mem>> -> memref<1x!tpu.dma_semaphore, #tpu.memory_space<semaphore_mem>>
    %316 = tpu.memref_squeeze %315 : memref<1x!tpu.dma_semaphore, #tpu.memory_space<semaphore_mem>> -> memref<!tpu.dma_semaphore, #tpu.memory_space<semaphore_mem>>
    tpu.wait_dma2 semaphore(%316 : memref<!tpu.dma_semaphore, #tpu.memory_space<semaphore_mem>>) src(%313 : memref<1x32xf32, #tpu.memory_space<any>>) dst(%314 : memref<1x32xf32, #tpu.memory_space<vmem>>)
    %c31_252 = arith.constant 31 : index
    %317 = memref.load %arg0[%c31_252] : memref<32xi32, #tpu.memory_space<smem>>
    %c31_i32_253 = arith.constant 31 : i32
    %c0_i32_254 = arith.constant 0 : i32
    %318 = tpu.memref_slice %arg1[%317, %c0_i32_254] : memref<50x32xf32, #tpu.memory_space<any>> -> memref<1x32xf32, #tpu.memory_space<any>>
    %c31_i32_255 = arith.constant 31 : i32
    %c0_i32_256 = arith.constant 0 : i32
    %319 = tpu.memref_slice %arg4[%c31_i32_255, %c0_i32_256] : memref<40x32xf32, #tpu.memory_space<vmem>> -> memref<1x32xf32, #tpu.memory_space<vmem>>
    %320 = tpu.memref_slice %arg5[%c31_i32_253] : memref<32x!tpu.dma_semaphore, #tpu.memory_space<semaphore_mem>> -> memref<1x!tpu.dma_semaphore, #tpu.memory_space<semaphore_mem>>
    %321 = tpu.memref_squeeze %320 : memref<1x!tpu.dma_semaphore, #tpu.memory_space<semaphore_mem>> -> memref<!tpu.dma_semaphore, #tpu.memory_space<semaphore_mem>>
    tpu.wait_dma2 semaphore(%321 : memref<!tpu.dma_semaphore, #tpu.memory_space<semaphore_mem>>) src(%318 : memref<1x32xf32, #tpu.memory_space<any>>) dst(%319 : memref<1x32xf32, #tpu.memory_space<vmem>>)
    %c0_257 = arith.constant 0 : index
    %c0_258 = arith.constant 0 : index
    %322 = vector.load %arg4[%c0_257, %c0_258] : memref<40x32xf32, #tpu.memory_space<vmem>>, vector<32x32xf32>
    %c0_259 = arith.constant 0 : index
    %c0_260 = arith.constant 0 : index
    %323 = vector.load %arg2[%c0_259, %c0_260] : memref<168x128xf32, #tpu.memory_space<vmem>>, vector<32x16xf32>
    %cst_261 = arith.constant dense<0.000000e+00> : vector<32x16xf32>
    %324 = tpu.matmul %322, %323, %cst_261 {dimension_numbers = #tpu.dot_dimension_numbers<[1], [0], [0], [1], [0, 0, 1, 1], [], []>} : vector<32x32xf32>, vector<32x16xf32>, vector<32x16xf32> -> vector<32x16xf32>
    %c1_262 = arith.constant 1 : index
    %c0_263 = arith.constant 0 : index
    %325 = vector.load %arg4[%c1_262, %c0_263] : memref<40x32xf32, #tpu.memory_space<vmem>>, vector<32x32xf32>
    %c32_264 = arith.constant 32 : index
    %c0_265 = arith.constant 0 : index
    %326 = vector.load %arg2[%c32_264, %c0_265] : memref<168x128xf32, #tpu.memory_space<vmem>>, vector<32x16xf32>
    %cst_266 = arith.constant dense<0.000000e+00> : vector<32x16xf32>
    %327 = tpu.matmul %325, %326, %cst_266 {dimension_numbers = #tpu.dot_dimension_numbers<[1], [0], [0], [1], [0, 0, 1, 1], [], []>} : vector<32x32xf32>, vector<32x16xf32>, vector<32x16xf32> -> vector<32x16xf32>
    %328 = arith.addf %324, %327 : vector<32x16xf32>
    %c2_267 = arith.constant 2 : index
    %c0_268 = arith.constant 0 : index
    %329 = vector.load %arg4[%c2_267, %c0_268] : memref<40x32xf32, #tpu.memory_space<vmem>>, vector<32x32xf32>
    %c64 = arith.constant 64 : index
    %c0_269 = arith.constant 0 : index
    %330 = vector.load %arg2[%c64, %c0_269] : memref<168x128xf32, #tpu.memory_space<vmem>>, vector<32x16xf32>
    %cst_270 = arith.constant dense<0.000000e+00> : vector<32x16xf32>
    %331 = tpu.matmul %329, %330, %cst_270 {dimension_numbers = #tpu.dot_dimension_numbers<[1], [0], [0], [1], [0, 0, 1, 1], [], []>} : vector<32x32xf32>, vector<32x16xf32>, vector<32x16xf32> -> vector<32x16xf32>
    %332 = arith.addf %328, %331 : vector<32x16xf32>
    %c96 = arith.constant 96 : index
    %c0_271 = arith.constant 0 : index
    %333 = vector.load %arg2[%c96, %c0_271] : memref<168x128xf32, #tpu.memory_space<vmem>>, vector<1x16xf32>
    %334 = vector.broadcast %333 : vector<1x16xf32> to vector<32x16xf32>
    %335 = arith.addf %332, %334 : vector<32x16xf32>
    %cst_272 = arith.constant 0.000000e+00 : f32
    %336 = vector.broadcast %cst_272 : f32 to vector<32x16xf32>
    %337 = arith.maximumf %335, %336 : vector<32x16xf32>
    %338 = vector.shape_cast %337 : vector<32x16xf32> to vector<2x16x16xf32>
    %339 = tpu.iota {dimensions = array<i32: 1>} : vector<2x16x16xi32>
    %c14_i32_273 = arith.constant 14 : i32
    %340 = vector.broadcast %c14_i32_273 : i32 to vector<2x16x16xi32>
    %341 = arith.cmpi slt, %339, %340 : vector<2x16x16xi32>
    %cst_274 = arith.constant 0.000000e+00 : f32
    %342 = vector.broadcast %cst_274 : f32 to vector<2x16x16xf32>
    %343 = arith.select %341, %338, %342 : vector<2x16x16xi1>, vector<2x16x16xf32>
    %cst_275 = arith.constant dense<0xFF800000> : vector<2x16xf32>
    %344 = vector.multi_reduction <maximumf>, %343, %cst_275 [1] : vector<2x16x16xf32> to vector<2x16xf32>
    %cst_276 = arith.constant 0.000000e+00 : f32
    %345 = vector.broadcast %cst_276 : f32 to vector<6x16xf32>
    %346 = tpu.concatenate %344, %345 in 0 : vector<2x16xf32>, vector<6x16xf32> -> vector<8x16xf32>
    %c104 = arith.constant 104 : index
    %c0_277 = arith.constant 0 : index
    %347 = vector.load %arg2[%c104, %c0_277] : memref<168x128xf32, #tpu.memory_space<vmem>>, vector<16x32xf32>
    %c120 = arith.constant 120 : index
    %c0_278 = arith.constant 0 : index
    %348 = vector.load %arg2[%c120, %c0_278] : memref<168x128xf32, #tpu.memory_space<vmem>>, vector<1x32xf32>
    %cst_279 = arith.constant dense<0.000000e+00> : vector<8x32xf32>
    %349 = tpu.matmul %346, %347, %cst_279 {dimension_numbers = #tpu.dot_dimension_numbers<[1], [0], [0], [1], [0, 0, 1, 1], [], []>} : vector<8x16xf32>, vector<16x32xf32>, vector<8x32xf32> -> vector<8x32xf32>
    %350 = vector.broadcast %348 : vector<1x32xf32> to vector<8x32xf32>
    %351 = arith.addf %349, %350 : vector<8x32xf32>
    %cst_280 = arith.constant 0.000000e+00 : f32
    %352 = vector.broadcast %cst_280 : f32 to vector<8x32xf32>
    %353 = arith.maximumf %351, %352 : vector<8x32xf32>
    %c128 = arith.constant 128 : index
    %c0_281 = arith.constant 0 : index
    %354 = vector.load %arg2[%c128, %c0_281] : memref<168x128xf32, #tpu.memory_space<vmem>>, vector<32x128xf32>
    %c160 = arith.constant 160 : index
    %c0_282 = arith.constant 0 : index
    %355 = vector.load %arg2[%c160, %c0_282] : memref<168x128xf32, #tpu.memory_space<vmem>>, vector<1x128xf32>
    %cst_283 = arith.constant dense<0.000000e+00> : vector<8x128xf32>
    %356 = tpu.matmul %353, %354, %cst_283 {dimension_numbers = #tpu.dot_dimension_numbers<[1], [0], [0], [1], [0, 0, 1, 1], [], []>} : vector<8x32xf32>, vector<32x128xf32>, vector<8x128xf32> -> vector<8x128xf32>
    %357 = vector.broadcast %355 : vector<1x128xf32> to vector<8x128xf32>
    %358 = arith.addf %356, %357 : vector<8x128xf32>
    %cst_284 = arith.constant 0.000000e+00 : f32
    %359 = vector.broadcast %cst_284 : f32 to vector<8x128xf32>
    %360 = arith.subf %359, %358 : vector<8x128xf32>
    %361 = math.exp %360 : vector<8x128xf32>
    %cst_285 = arith.constant 1.000000e+00 : f32
    %362 = vector.broadcast %cst_285 : f32 to vector<8x128xf32>
    %363 = arith.addf %362, %361 : vector<8x128xf32>
    %364 = tpu.reciprocal %363 {approx = true} : vector<8x128xf32> -> vector<8x128xf32>
    %c0_286 = arith.constant 0 : index
    %c0_287 = arith.constant 0 : index
    %365 = vector.load %arg3[%c0_286, %c0_287] : memref<8x128xf32, #tpu.memory_space<vmem>>, vector<8x128xf32>
    tpu.vector_store %arg3[%c0_286, %c0_287], %364 {strides = array<i32>} : memref<8x128xf32, #tpu.memory_space<vmem>>, vector<8x128xf32>,
    return
  }
}

</mosaic_0001>

<bundles_post_ra>
// kernel: tpu_custom_call.1
= control target key start
LH: loop header
LB: loop body
LE: loop exit
PB: predicated region body
PF: predicated region fallthrough
CT: control target
= control target key end

     0   :  { %8 = vsyncpa [#allocation7], 0  ;;  %s3362_s0 = inlined_call_operand.vmem [shape: s32[32], index: 0, kind: input, shape index: {}]   ;;  %s3363_s1 = inlined_call_operand.vmem [shape: f32[50,32], index: 1, kind: input, shape index: {}]   ;;  %s3364_s2 = inlined_call_operand.hbm [shape: f32[168,128], index: 2, kind: input, shape index: {}]   ;;  %s3365_s3 = inlined_call_operand.hbm [shape: f32[8,128], index: 3, kind: output, shape index: {}]  }
   0x1   :  { %9 = vsyncpa [#allocation5], 0 }
   0x2   :  { %10 = vsyncpa [#allocation6], 0  ;;  %s17_s14 = sshll.u32 %s3362_s0, 4  ;;  %s18_s14 = int_to_ptr.vmem [resolvable:$true] %s17_s14 }
   0x3   :  { %s3078_s15 = scalar_lea.vmem %s18_s14, 16  ;;  %p3083_p1 = scmp.lt.s32.totalorder %s18_s14, %s18_s14 }
   0x4   :  { %p3079_p0 = scmp.ne.s32.totalorder %s18_s14, %s3078_s15  ;;  %p3084_p2 = scmp.lt.s32.totalorder %s3078_s15, %s3078_s15 }
   0x6   :  { %p3085_p3 = por %p3084_p2, %p3083_p1 }
   0x8   :  { %p3086_p4 = pnand %p3085_p3, %p3079_p0 }
   0xa   :  { %3089 = shalt.err (!%p3086_p4)
}
   0xb   :  { %s3200_s16 = smov [#allocation4]   ;;  %s3201_s17 = smov [#allocation8]  }
   0xc   :  { %20 = dma.vmem_to_smem %s18_s14, 16, %s3200_s16, [#allocation7]  }
   0xd   :  { %s26_s18 = sshll.u32 %s3201_s17, 4  ;;  %s27_s18 = int_to_ptr.vmem [resolvable:$true] %s26_s18 }
   0xe   :  { %s3098_s19 = scalar_lea.vmem %s27_s18, 2688  ;;  %p3103_p6 = scmp.lt.s32.totalorder %s27_s18, %s27_s18 }
   0xf   :  { %p3099_p5 = scmp.ne.s32.totalorder %s27_s18, %s3098_s19  ;;  %p3104_p7 = scmp.lt.s32.totalorder %s3098_s19, %s3098_s19 }
  0x11   :  { %p3105_p8 = por %p3104_p7, %p3103_p6 }
  0x13   :  { %p3106_p9 = pnand %p3105_p8, %p3099_p5 }
  0x15   :  { %3109 = shalt.err (!%p3106_p9)
}
  0x16   :  { %s3202_s0 = smov 128   ;;  %s3203_s20 = smov 8  }
  0x17   :  { %32 = dma.hbm_to_vmem [thread:$0]  %s3364_s2, 2688, %s27_s18, [#allocation5], %s3202_s0, %s3202_s0, %s3203_s20  }
  0x18   :  { %3130 = dma.done.wait [#allocation7], 16  }
  0x19   :  { %3131 = vsyncadd [#allocation7], 4294967280 }
  0x1a   :  { %3132 = dma.done.wait [#allocation5], 2688  }
  0x1b   :  { %3133 = vsyncadd [#allocation5], 4294964608 }
  0x1c   :  { %39 = sfence }
  0x1d   :  { %vm40_vm0 = vcmask 261120   ;;  %s42_s23 = sld [smem:[#allocation4]]  ;;  %v3204_v0 = vmov 0.0  }
  0x1e   :  { %41 = vst.msk [vmem:[#allocation2 + $0x20] sm:$0xff] %vm40_vm0, %v3204_v0 }
  0x23   :  { %s43_s26 = scalar_lea.vmem %s3363_s1, %s42_s23 }
  0x24   :  { %v62_v1 = vld [vmem:[%s43_s26] sm:$0x1] }
  0x25   :  { %63 = vst [vmem:[#allocation2] sm:$0x1] %v62_v1 }
  0x26   :  { %89 = vsyncadd [#allocation3], 16  ;;  %s2895_s27 = sld [smem:[#allocation4 + $0x1]] }
  0x2c   :  { %s91_s29 = scalar_lea.vmem %s3363_s1, %s2895_s27 }
  0x2d   :  { %v112_v2 = vld [vmem:[%s91_s29] sm:$0x1] }
  0x2e   :  { %113 = vst [vmem:[#allocation2 + $0x1] sm:$0x1] %v112_v2 }
  0x2f   :  { %139 = vsyncadd [#allocation3 + $0x1], 16  ;;  %s2896_s30 = sld [smem:[#allocation4 + $0x2]] }
  0x35   :  { %s141_s6 = scalar_lea.vmem %s3363_s1, %s2896_s30 }
  0x36   :  { %v162_v3 = vld [vmem:[%s141_s6] sm:$0x1] }
  0x37   :  { %163 = vst [vmem:[#allocation2 + $0x2] sm:$0x1] %v162_v3 }
  0x38   :  { %189 = vsyncadd [#allocation3 + $0x2], 16  ;;  %s2897_s7 = sld [smem:[#allocation4 + $0x3]] }
  0x3e   :  { %s191_s10 = scalar_lea.vmem %s3363_s1, %s2897_s7 }
  0x3f   :  { %v212_v4 = vld [vmem:[%s191_s10] sm:$0x1] }
  0x40   :  { %213 = vst [vmem:[#allocation2 + $0x3] sm:$0x1] %v212_v4 }
  0x41   :  { %239 = vsyncadd [#allocation3 + $0x3], 16  ;;  %s2898_s11 = sld [smem:[#allocation4 + $0x4]] }
  0x47   :  { %s241_s14 = scalar_lea.vmem %s3363_s1, %s2898_s11 }
  0x48   :  { %v262_v5 = vld [vmem:[%s241_s14] sm:$0x1] }
  0x49   :  { %263 = vst [vmem:[#allocation2 + $0x4] sm:$0x1] %v262_v5 }
  0x4a   :  { %289 = vsyncadd [#allocation3 + $0x4], 16  ;;  %s2899_s15 = sld [smem:[#allocation4 + $0x5]] }
  0x50   :  { %s291_s18 = scalar_lea.vmem %s3363_s1, %s2899_s15 }
  0x51   :  { %v312_v6 = vld [vmem:[%s291_s18] sm:$0x1] }
  0x52   :  { %313 = vst [vmem:[#allocation2 + $0x5] sm:$0x1] %v312_v6 }
  0x53   :  { %339 = vsyncadd [#allocation3 + $0x5], 16  ;;  %s2900_s19 = sld [smem:[#allocation4 + $0x6]] }
  0x59   :  { %s341_s21 = scalar_lea.vmem %s3363_s1, %s2900_s19 }
  0x5a   :  { %v362_v7 = vld [vmem:[%s341_s21] sm:$0x1] }
  0x5b   :  { %363 = vst [vmem:[#allocation2 + $0x6] sm:$0x1] %v362_v7 }
  0x5c   :  { %389 = vsyncadd [#allocation3 + $0x6], 16  ;;  %s2901_s22 = sld [smem:[#allocation4 + $0x7]] }
  0x62   :  { %s391_s25 = scalar_lea.vmem %s3363_s1, %s2901_s22 }
  0x63   :  { %v412_v8 = vld [vmem:[%s391_s25] sm:$0x1] }
  0x64   :  { %413 = vst [vmem:[#allocation2 + $0x7] sm:$0x1] %v412_v8 }
  0x65   :  { %439 = vsyncadd [#allocation3 + $0x7], 16  ;;  %s2902_s26 = sld [smem:[#allocation4 + $0x8]] }
  0x6b   :  { %s441_s28 = scalar_lea.vmem %s3363_s1, %s2902_s26 }
  0x6c   :  { %v462_v9 = vld [vmem:[%s441_s28] sm:$0x1] }
  0x6d   :  { %463 = vst [vmem:[#allocation2 + $0x8] sm:$0x1] %v462_v9 }
  0x6e   :  { %489 = vsyncadd [#allocation3 + $0x8], 16  ;;  %s2903_s29 = sld [smem:[#allocation4 + $0x9]] }
  0x74   :  { %s491_s5 = scalar_lea.vmem %s3363_s1, %s2903_s29 }
  0x75   :  { %v512_v10 = vld [vmem:[%s491_s5] sm:$0x1] }
  0x76   :  { %513 = vst [vmem:[#allocation2 + $0x9] sm:$0x1] %v512_v10 }
  0x77   :  { %539 = vsyncadd [#allocation3 + $0x9], 16  ;;  %s2904_s6 = sld [smem:[#allocation4 + $0xa]] }
  0x7d   :  { %s541_s9 = scalar_lea.vmem %s3363_s1, %s2904_s6 }
  0x7e   :  { %v562_v11 = vld [vmem:[%s541_s9] sm:$0x1] }
  0x7f   :  { %563 = vst [vmem:[#allocation2 + $0xa] sm:$0x1] %v562_v11 }
  0x80   :  { %589 = vsyncadd [#allocation3 + $0xa], 16  ;;  %s2905_s10 = sld [smem:[#allocation4 + $0xb]] }
  0x86   :  { %s591_s13 = scalar_lea.vmem %s3363_s1, %s2905_s10 }
  0x87   :  { %v612_v12 = vld [vmem:[%s591_s13] sm:$0x1] }
  0x88   :  { %613 = vst [vmem:[#allocation2 + $0xb] sm:$0x1] %v612_v12 }
  0x89   :  { %639 = vsyncadd [#allocation3 + $0xb], 16  ;;  %s2906_s14 = sld [smem:[#allocation4 + $0xc]] }
  0x8f   :  { %s641_s17 = scalar_lea.vmem %s3363_s1, %s2906_s14 }
  0x90   :  { %v662_v13 = vld [vmem:[%s641_s17] sm:$0x1] }
  0x91   :  { %663 = vst [vmem:[#allocation2 + $0xc] sm:$0x1] %v662_v13 }
  0x92   :  { %689 = vsyncadd [#allocation3 + $0xc], 16  ;;  %s2907_s18 = sld [smem:[#allocation4 + $0xd]] }
  0x98   :  { %s691_s20 = scalar_lea.vmem %s3363_s1, %s2907_s18 }
  0x99   :  { %v712_v14 = vld [vmem:[%s691_s20] sm:$0x1] }
  0x9a   :  { %713 = vst [vmem:[#allocation2 + $0xd] sm:$0x1] %v712_v14 }
  0x9b   :  { %739 = vsyncadd [#allocation3 + $0xd], 16  ;;  %s2908_s21 = sld [smem:[#allocation4 + $0xe]] }
  0xa1   :  { %s741_s24 = scalar_lea.vmem %s3363_s1, %s2908_s21 }
  0xa2   :  { %v762_v15 = vld [vmem:[%s741_s24] sm:$0x1] }
  0xa3   :  { %763 = vst [vmem:[#allocation2 + $0xe] sm:$0x1] %v762_v15 }
  0xa4   :  { %789 = vsyncadd [#allocation3 + $0xe], 16  ;;  %s2909_s25 = sld [smem:[#allocation4 + $0xf]] }
  0xaa   :  { %s791_s2 = scalar_lea.vmem %s3363_s1, %s2909_s25 }
  0xab   :  { %v812_v16 = vld [vmem:[%s791_s2] sm:$0x1] }
  0xac   :  { %813 = vst [vmem:[#allocation2 + $0xf] sm:$0x1] %v812_v16 }
  0xad   :  { %839 = vsyncadd [#allocation3 + $0xf], 16  ;;  %s2910_s28 = sld [smem:[#allocation4 + $0x10]] }
  0xb3   :  { %s841_s4 = scalar_lea.vmem %s3363_s1, %s2910_s28 }
  0xb4   :  { %v862_v17 = vld [vmem:[%s841_s4] sm:$0x1] }
  0xb5   :  { %863 = vst [vmem:[#allocation2 + $0x10] sm:$0x1] %v862_v17 }
  0xb6   :  { %889 = vsyncadd [#allocation3 + $0x10], 16  ;;  %s2911_s5 = sld [smem:[#allocation4 + $0x11]] }
  0xbc   :  { %s891_s8 = scalar_lea.vmem %s3363_s1, %s2911_s5 }
  0xbd   :  { %v912_v18 = vld [vmem:[%s891_s8] sm:$0x1] }
  0xbe   :  { %913 = vst [vmem:[#allocation2 + $0x11] sm:$0x1] %v912_v18 }
  0xbf   :  { %939 = vsyncadd [#allocation3 + $0x11], 16  ;;  %s2912_s9 = sld [smem:[#allocation4 + $0x12]] }
  0xc5   :  { %s941_s12 = scalar_lea.vmem %s3363_s1, %s2912_s9 }
  0xc6   :  { %v962_v19 = vld [vmem:[%s941_s12] sm:$0x1] }
  0xc7   :  { %963 = vst [vmem:[#allocation2 + $0x12] sm:$0x1] %v962_v19 }
  0xc8   :  { %989 = vsyncadd [#allocation3 + $0x12], 16  ;;  %s2913_s13 = sld [smem:[#allocation4 + $0x13]] }
  0xce   :  { %s991_s16 = scalar_lea.vmem %s3363_s1, %s2913_s13 }
  0xcf   :  { %v1012_v20 = vld [vmem:[%s991_s16] sm:$0x1] }
  0xd0   :  { %1013 = vst [vmem:[#allocation2 + $0x13] sm:$0x1] %v1012_v20 }
  0xd1   :  { %1039 = vsyncadd [#allocation3 + $0x13], 16  ;;  %s2914_s17 = sld [smem:[#allocation4 + $0x14]] }
  0xd7   :  { %s1041_s0 = scalar_lea.vmem %s3363_s1, %s2914_s17 }
  0xd8   :  { %v1062_v21 = vld [vmem:[%s1041_s0] sm:$0x1] }
  0xd9   :  { %1063 = vst [vmem:[#allocation2 + $0x14] sm:$0x1] %v1062_v21 }
  0xda   :  { %1089 = vsyncadd [#allocation3 + $0x14], 16  ;;  %s2915_s20 = sld [smem:[#allocation4 + $0x15]] }
  0xe0   :  { %s1091_s23 = scalar_lea.vmem %s3363_s1, %s2915_s20 }
  0xe1   :  { %v1112_v22 = vld [vmem:[%s1091_s23] sm:$0x1] }
  0xe2   :  { %1113 = vst [vmem:[#allocation2 + $0x15] sm:$0x1] %v1112_v22 }
  0xe3   :  { %1139 = vsyncadd [#allocation3 + $0x15], 16  ;;  %s2916_s24 = sld [smem:[#allocation4 + $0x16]] }
  0xe9   :  { %s1141_s27 = scalar_lea.vmem %s3363_s1, %s2916_s24 }
  0xea   :  { %v1162_v23 = vld [vmem:[%s1141_s27] sm:$0x1] }
  0xeb   :  { %1163 = vst [vmem:[#allocation2 + $0x16] sm:$0x1] %v1162_v23 }
  0xec   :  { %1189 = vsyncadd [#allocation3 + $0x16], 16  ;;  %s2917_s2 = sld [smem:[#allocation4 + $0x17]] }
  0xf2   :  { %s1191_s30 = scalar_lea.vmem %s3363_s1, %s2917_s2 }
  0xf3   :  { %v1212_v24 = vld [vmem:[%s1191_s30] sm:$0x1] }
  0xf4   :  { %1213 = vst [vmem:[#allocation2 + $0x17] sm:$0x1] %v1212_v24 }
  0xf5   :  { %1239 = vsyncadd [#allocation3 + $0x17], 16  ;;  %s2918_s4 = sld [smem:[#allocation4 + $0x18]] }
  0xfb   :  { %s1241_s7 = scalar_lea.vmem %s3363_s1, %s2918_s4 }
  0xfc   :  { %v1262_v25 = vld [vmem:[%s1241_s7] sm:$0x1] }
  0xfd   :  { %1263 = vst [vmem:[#allocation2 + $0x18] sm:$0x1] %v1262_v25 }
  0xfe   :  { %1289 = vsyncadd [#allocation3 + $0x18], 16  ;;  %s2919_s8 = sld [smem:[#allocation4 + $0x19]] }
 0x104   :  { %s1291_s11 = scalar_lea.vmem %s3363_s1, %s2919_s8 }
 0x105   :  { %v1312_v26 = vld [vmem:[%s1291_s11] sm:$0x1] }
 0x106   :  { %1313 = vst [vmem:[#allocation2 + $0x19] sm:$0x1] %v1312_v26 }
 0x107   :  { %1339 = vsyncadd [#allocation3 + $0x19], 16  ;;  %s2920_s12 = sld [smem:[#allocation4 + $0x1a]] }
 0x10d   :  { %s1341_s15 = scalar_lea.vmem %s3363_s1, %s2920_s12 }
 0x10e   :  { %v1362_v27 = vld [vmem:[%s1341_s15] sm:$0x1] }
 0x10f   :  { %1363 = vst [vmem:[#allocation2 + $0x1a] sm:$0x1] %v1362_v27 }
 0x110   :  { %1389 = vsyncadd [#allocation3 + $0x1a], 16  ;;  %s2921_s16 = sld [smem:[#allocation4 + $0x1b]] }
 0x116   :  { %s1391_s19 = scalar_lea.vmem %s3363_s1, %s2921_s16 }
 0x117   :  { %v1412_v28 = vld [vmem:[%s1391_s19] sm:$0x1] }
 0x118   :  { %1413 = vst [vmem:[#allocation2 + $0x1b] sm:$0x1] %v1412_v28 }
 0x119   :  { %1439 = vsyncadd [#allocation3 + $0x1b], 16  ;;  %s2922_s0 = sld [smem:[#allocation4 + $0x1c]] }
 0x11f   :  { %s1441_s22 = scalar_lea.vmem %s3363_s1, %s2922_s0 }
 0x120   :  { %v1462_v29 = vld [vmem:[%s1441_s22] sm:$0x1] }
 0x121   :  { %1463 = vst [vmem:[#allocation2 + $0x1c] sm:$0x1] %v1462_v29 }
 0x122   :  { %1489 = vsyncadd [#allocation3 + $0x1c], 16  ;;  %s2923_s23 = sld [smem:[#allocation4 + $0x1d]] }
 0x128   :  { %s1491_s26 = scalar_lea.vmem %s3363_s1, %s2923_s23 }
 0x129   :  { %v1512_v30 = vld [vmem:[%s1491_s26] sm:$0x1] }
 0x12a   :  { %1513 = vst [vmem:[#allocation2 + $0x1d] sm:$0x1] %v1512_v30 }
 0x12b   :  { %1539 = vsyncadd [#allocation3 + $0x1d], 16  ;;  %s2924_s27 = sld [smem:[#allocation4 + $0x1e]] }
 0x131   :  { %s1541_s29 = scalar_lea.vmem %s3363_s1, %s2924_s27 }
 0x132   :  { %v1562_v31 = vld [vmem:[%s1541_s29] sm:$0x1] }
 0x133   :  { %1563 = vst [vmem:[#allocation2 + $0x1e] sm:$0x1] %v1562_v31 }
 0x134   :  { %1589 = vsyncadd [#allocation3 + $0x1e], 16  ;;  %s2925_s30 = sld [smem:[#allocation4 + $0x1f]] }
 0x13a   :  { %s1591_s6 = scalar_lea.vmem %s3363_s1, %s2925_s30 }
 0x13b   :  { %v1612_v32 = vld [vmem:[%s1591_s6] sm:$0x1] }
 0x13c   :  { %1613 = vst [vmem:[#allocation2 + $0x1f] sm:$0x1] %v1612_v32 }
 0x13d   :  { %1639 = vsyncadd [#allocation3 + $0x1f], 16 }
 0x13e   :  { %3134 = dma.done.wait [#allocation3], 16 }
 0x13f   :  { %3135 = vsyncadd [#allocation3], 4294967280 }
 0x140   :  { %3136 = dma.done.wait [#allocation3 + $0x1], 16 }
 0x141   :  { %3137 = vsyncadd [#allocation3 + $0x1], 4294967280 }
 0x142   :  { %3138 = dma.done.wait [#allocation3 + $0x2], 16 }
 0x143   :  { %3139 = vsyncadd [#allocation3 + $0x2], 4294967280 }
 0x144   :  { %3140 = dma.done.wait [#allocation3 + $0x3], 16 }
 0x145   :  { %3141 = vsyncadd [#allocation3 + $0x3], 4294967280 }
 0x146   :  { %3142 = dma.done.wait [#allocation3 + $0x4], 16 }
 0x147   :  { %3143 = vsyncadd [#allocation3 + $0x4], 4294967280 }
 0x148   :  { %3144 = dma.done.wait [#allocation3 + $0x5], 16 }
 0x149   :  { %3145 = vsyncadd [#allocation3 + $0x5], 4294967280 }
 0x14a   :  { %3146 = dma.done.wait [#allocation3 + $0x6], 16 }
 0x14b   :  { %3147 = vsyncadd [#allocation3 + $0x6], 4294967280 }
 0x14c   :  { %3148 = dma.done.wait [#allocation3 + $0x7], 16 }
 0x14d   :  { %3149 = vsyncadd [#allocation3 + $0x7], 4294967280 }
 0x14e   :  { %3150 = dma.done.wait [#allocation3 + $0x8], 16 }
 0x14f   :  { %3151 = vsyncadd [#allocation3 + $0x8], 4294967280 }
 0x150   :  { %3152 = dma.done.wait [#allocation3 + $0x9], 16 }
 0x151   :  { %3153 = vsyncadd [#allocation3 + $0x9], 4294967280 }
 0x152   :  { %3154 = dma.done.wait [#allocation3 + $0xa], 16 }
 0x153   :  { %3155 = vsyncadd [#allocation3 + $0xa], 4294967280 }
 0x154   :  { %3156 = dma.done.wait [#allocation3 + $0xb], 16 }
 0x155   :  { %3157 = vsyncadd [#allocation3 + $0xb], 4294967280 }
 0x156   :  { %3158 = dma.done.wait [#allocation3 + $0xc], 16 }
 0x157   :  { %3159 = vsyncadd [#allocation3 + $0xc], 4294967280 }
 0x158   :  { %3160 = dma.done.wait [#allocation3 + $0xd], 16 }
 0x159   :  { %3161 = vsyncadd [#allocation3 + $0xd], 4294967280 }
 0x15a   :  { %3162 = dma.done.wait [#allocation3 + $0xe], 16 }
 0x15b   :  { %3163 = vsyncadd [#allocation3 + $0xe], 4294967280 }
 0x15c   :  { %3164 = dma.done.wait [#allocation3 + $0xf], 16 }
 0x15d   :  { %3165 = vsyncadd [#allocation3 + $0xf], 4294967280 }
 0x15e   :  { %3166 = dma.done.wait [#allocation3 + $0x10], 16 }
 0x15f   :  { %3167 = vsyncadd [#allocation3 + $0x10], 4294967280 }
 0x160   :  { %3168 = dma.done.wait [#allocation3 + $0x11], 16 }
 0x161   :  { %3169 = vsyncadd [#allocation3 + $0x11], 4294967280 }
 0x162   :  { %3170 = dma.done.wait [#allocation3 + $0x12], 16 }
 0x163   :  { %3171 = vsyncadd [#allocation3 + $0x12], 4294967280 }
 0x164   :  { %3172 = dma.done.wait [#allocation3 + $0x13], 16 }
 0x165   :  { %3173 = vsyncadd [#allocation3 + $0x13], 4294967280 }
 0x166   :  { %3174 = dma.done.wait [#allocation3 + $0x14], 16 }
 0x167   :  { %3175 = vsyncadd [#allocation3 + $0x14], 4294967280 }
 0x168   :  { %3176 = dma.done.wait [#allocation3 + $0x15], 16 }
 0x169   :  { %3177 = vsyncadd [#allocation3 + $0x15], 4294967280 }
 0x16a   :  { %3178 = dma.done.wait [#allocation3 + $0x16], 16 }
 0x16b   :  { %3179 = vsyncadd [#allocation3 + $0x16], 4294967280 }
 0x16c   :  { %3180 = dma.done.wait [#allocation3 + $0x17], 16 }
 0x16d   :  { %3181 = vsyncadd [#allocation3 + $0x17], 4294967280 }
 0x16e   :  { %3182 = dma.done.wait [#allocation3 + $0x18], 16 }
 0x16f   :  { %3183 = vsyncadd [#allocation3 + $0x18], 4294967280 }
 0x170   :  { %3184 = dma.done.wait [#allocation3 + $0x19], 16 }
 0x171   :  { %3185 = vsyncadd [#allocation3 + $0x19], 4294967280 }
 0x172   :  { %3186 = dma.done.wait [#allocation3 + $0x1a], 16 }
 0x173   :  { %3187 = vsyncadd [#allocation3 + $0x1a], 4294967280 }
 0x174   :  { %3188 = dma.done.wait [#allocation3 + $0x1b], 16 }
 0x175   :  { %3189 = vsyncadd [#allocation3 + $0x1b], 4294967280 }
 0x176   :  { %3190 = dma.done.wait [#allocation3 + $0x1c], 16 }
 0x177   :  { %3191 = vsyncadd [#allocation3 + $0x1c], 4294967280 }
 0x178   :  { %3192 = dma.done.wait [#allocation3 + $0x1d], 16 }
 0x179   :  { %3193 = vsyncadd [#allocation3 + $0x1d], 4294967280 }
 0x17a   :  { %3194 = dma.done.wait [#allocation3 + $0x1e], 16 }
 0x17b   :  { %3195 = vsyncadd [#allocation3 + $0x1e], 4294967280 }
 0x17c   :  { %3196 = dma.done.wait [#allocation3 + $0x1f], 16 }
 0x17d   :  { %3197 = vsyncadd [#allocation3 + $0x1f], 4294967280  ;;  %v1752_v33 = vld [vmem:[#allocation8 + $0x38] sm:$0xff]  ;;  %v1751_v35 = vld [vmem:[#allocation8 + $0x30] sm:$0xff]  ;;  %vm3205_vm1 = vmmov 0   ;;  %v2069_v62 = vlaneseq  ;;  %vm2078_vm3 = vcmask 130048  }
 0x17e   :  { %v1744_v34 = vld [vmem:[#allocation8 + $0x18] sm:$0xff]  ;;  %3007 = vmatprep.subr.mxu0 %v1752_v33  ;;  %v1743_v36 = vld [vmem:[#allocation8 + $0x10] sm:$0xff]  ;;  %v1750_v37 = vld [vmem:[#allocation8 + $0x28] sm:$0xff]  ;;  %vm2099_vm4 = vcmask 1041409   ;;  %vm2102_vm5 = vcmask 1041408   ;;  %s3206_s1 = smov [#allocation9]  }
 0x17f   :  { %3021 = vmatprep.subr.mxu1 %v1744_v34  ;;  %3008 = vmatpush3.msra.mxu0 %v1752_v33  ;;  %v1742_v38 = vld [vmem:[#allocation8 + $0x8] sm:$0xff]  ;;  %v1749_v39 = vld [vmem:[#allocation8 + $0x20] sm:$0xff]  ;;  %v1737_v42 = vld [vmem:[#allocation2] sm:$0xff]  ;;  %v2070_v3 = vshrl.u32 %v2069_v62, 7  ;;  %s2279_s7 = sshll.u32 %s3206_s1, 4  ;;  %s2280_s7 = int_to_ptr.vmem [resolvable:$true] %s2279_s7 }
 0x180   :  { %3022 = vmatpush3.msra.mxu1 %v1744_v34  ;;  %3009 = vmatprep.subr.mxu0 %v1751_v35  ;;  %v1741_v40 = vld [vmem:[#allocation8] sm:$0xff]  ;;  %v1954_v45 = vld [vmem:[#allocation8 + $0x58] sm:$0xff]  ;;  %v1747_v46 = vld [vmem:[#allocation2 + $0x11] sm:$0xff]  ;;  %s3110_s8 = scalar_lea.vmem %s2280_s7, 128  ;;  %p3115_p11 = scmp.lt.s32.totalorder %s2280_s7, %s2280_s7 }
 0x181   :  { %3023 = vmatprep.subr.mxu1 %v1743_v36  ;;  %3010 = vmatpush3.msra.mxu0 %v1751_v35  ;;  %v1745_v41 = vld [vmem:[#allocation2 + $0x1] sm:$0xff]  ;;  %v1746_v43 = vld [vmem:[#allocation2 + $0x9] sm:$0xff]  ;;  %v1953_v48 = vld [vmem:[#allocation8 + $0x50] sm:$0xff]  ;;  %v2071_v9 = vadd.s32 8, %v2070_v3  ;;  %p3111_p10 = scmp.ne.s32.totalorder %s2280_s7, %s3110_s8  ;;  %p3116_p12 = scmp.lt.s32.totalorder %s3110_s8, %s3110_s8 }
 0x182   :  { %3024 = vmatpush3.msra.mxu1 %v1743_v36  ;;  %3011 = vmatprep.subr.mxu0 %v1750_v37  ;;  %v1738_v44 = vld [vmem:[#allocation2 + $0x8] sm:$0xff]  ;;  %v1739_v47 = vld [vmem:[#allocation2 + $0x10] sm:$0xff]  ;;  %v1740_v49 = vld [vmem:[#allocation2 + $0x18] sm:$0xff] }
 0x183   :  { %3025 = vmatprep.subr.mxu1 %v1742_v38  ;;  %3012 = vmatpush3.msra.mxu0 %v1750_v37  ;;  %v1748_v50 = vld [vmem:[#allocation2 + $0x19] sm:$0xff]  ;;  %v1952_v51 = vld [vmem:[#allocation8 + $0x48] sm:$0xff]  ;;  %v1947_v52 = vld [vmem:[#allocation2 + $0x2] sm:$0xff]  ;;  %vm2073_vm2 = vcmp.lt.s32.totalorder %v2071_v9, 14  ;;  %p3117_p13 = por %p3116_p12, %p3115_p11 }
 0x184   :  { %3026 = vmatpush3.msra.mxu1 %v1742_v38  ;;  %3013 = vmatprep.subr.mxu0 %v1749_v39  ;;  %v1951_v53 = vld [vmem:[#allocation8 + $0x40] sm:$0xff]  ;;  %v1949_v55 = vld [vmem:[#allocation2 + $0x12] sm:$0xff]  ;;  %v1950_v56 = vld [vmem:[#allocation2 + $0x1a] sm:$0xff] }
 0x185   :  { %3027 = vmatprep.subr.mxu1 %v1741_v40  ;;  %3014 = vmatpush3.msra.mxu0 %v1749_v39  ;;  %v1948_v54 = vld [vmem:[#allocation2 + $0xa] sm:$0xff]  ;;  %v2105_v57 = vld [vmem:[#allocation8 + $0x70] sm:$0xff]  ;;  %v2188_v59 = vld [vmem:[#allocation8 + $0x98] sm:$0xff]  ;;  %p3118_p0 = pnand %p3117_p13, %p3111_p10 }
 0x186   :  { %3015 = vmatprep.mubr.msk.f32.mxu0 %vm40_vm0, %v1745_v41  ;;  %3028 = vmatpush3.msra.mxu1 %v1741_v40  ;;  %v2104_v58 = vld [vmem:[#allocation8 + $0x68] sm:$0xff]  ;;  %v2938_v8 = vld [vmem:[#allocation8 + $0x60] ss:$0 sm:$0xff] }
 0x187   :  { %3029 = vmatprep.mubr.msk.f32.mxu1 %vm40_vm0, %v1737_v42  ;;  %3016 = vmatmul.mubr.msk.f32.vlgmr.msra.gmra.mxu0 %vm40_vm0, %v1746_v43 }
 0x188   :  { %3030 = vmatmul.mubr.msk.f32.vlgmr.msra.gmra.mxu1 %vm40_vm0, %v1738_v44  ;;  %3035 = vmatprep.subr.mxu0 %v1954_v45 }
 0x189   :  { %3018 = vmatprep.mubr.msk.f32.mxu0 %vm40_vm0, %v1747_v46  ;;  %3036 = vmatpush3.msra.mxu0 %v1954_v45 }
 0x18a   :  { %3032 = vmatprep.mubr.msk.f32.mxu1 %vm40_vm0, %v1739_v47  ;;  %3037 = vmatprep.subr.mxu0 %v1953_v48 }
 0x18b   :  { %3049 = vmatprep.subr.mxu1 %v3204_v0  ;;  %3038 = vmatpush3.msra.mxu0 %v1953_v48 }
 0x18c   :  { %3033 = vmatmul.mubr.msk.f32.gmra.mxu1 %vm40_vm0, %v1740_v49  ;;  %3019 = vmatmul.mubr.msk.f32.gmra.mxu0 %vm40_vm0, %v1748_v50 }
 0x18d   :  { %3039 = vmatprep.subr.mxu0 %v1952_v51  ;;  %3043 = vmatprep.mubr.msk.f32.mxu0 %vm40_vm0, %v1947_v52  ;;  %v2186_v52 = vld [vmem:[#allocation8 + $0x88] sm:$0xff] }
 0x18e   :  { %3040 = vmatpush3.msra.mxu0 %v1952_v51  ;;  %3050 = vmatpush3.msra.mxu1 %v2105_v57  ;;  %v2187_v51 = vld [vmem:[#allocation8 + $0x90] sm:$0xff] }
 0x18f   :  { %3041 = vmatprep.subr.mxu0 %v1951_v53  ;;  %3053 = vmatprep.mubr.msk.f32.mxu1 %vm3205_vm1, %v3204_v0 }
 0x190   :  { %3042 = vmatpush3.msra.mxu0 %v1951_v53  ;;  %3051 = vmatprep.subr.mxu1 %v3204_v0  ;;  %v2185_v53 = vld [vmem:[#allocation8 + $0x80] sm:$0xff] }
 0x191   :  { %3044 = vmatmul.mubr.msk.f32.vlgmr.msra.gmra.mxu0 %vm40_vm0, %v1948_v54  ;;  %3056 = vmatprep.subr.mxu0 %v3204_v0  ;;  %v2939_v54 = vld [vmem:[#allocation8 + $0x78] ss:$0 sm:$0xff] }
 0x192   :  { %3046 = vmatprep.mubr.msk.f32.mxu0 %vm40_vm0, %v1949_v55  ;;  %3052 = vmatpush3.msra.mxu1 %v2104_v58 }
 0x193   :  { %3057 = vmatpush3.msra.mxu0 %v2188_v59  ;;  %v2941_v59 = vld [vmem:[#allocation8 + $0xa0] ss:$0 sm:$0xff] }
 0x194   :  { %3058 = vmatprep.subr.mxu0 %v3204_v0 }
 0x195   :  { %3047 = vmatmul.mubr.msk.f32.gmra.mxu0 %vm40_vm0, %v1950_v56 }
 0x196   :  { %3064 = vmatprep.mubr.msk.f32.mxu0 %vm3205_vm1, %v3204_v0  ;;  %3059 = vmatpush3.msra.mxu0 %v2187_v51 }
 0x197   :  { %3060 = vmatprep.subr.mxu0 %v3204_v0 }
 0x198   :  { %3061 = vmatpush3.msra.mxu0 %v2186_v52 }
 0x199   :  { %3062 = vmatprep.subr.mxu0 %v3204_v0 }
 0x19a   :  { %3063 = vmatpush3.msra.mxu0 %v2185_v53 }
 0x247   :  { %v3017_v60 = vpop.f32.mrf.mxu0 }
 0x248   :  { %v3031_v61 = vpop.f32.mrf.mxu1 }
 0x249   :  { %v1831_v63 = vpop.f32.mrf.mxu0  ;;  %v1934_v6 = vadd.f32 %v3031_v61, %v3017_v60 }
 0x24a   :  { %v1928_v1 = vpop.f32.mrf.mxu1 }
 0x24b   :  { %v1929_v10 = vadd.f32 %v1928_v1, %v1831_v63 }
 0x24c   :  { %v3020_v2 = vpop.f32.mrf.mxu0  ;;  %v3034_v4 = vpop.f32.mrf.mxu1 }
 0x24d   :  { %v1944_v14 = vadd.f32 %v3034_v4, %v3020_v2 }
 0x24e   :  { %v1841_v5 = vpop.f32.mrf.mxu0  ;;  %v1938_v12 = vpop.f32.mrf.mxu1 }
 0x24f   :  { %v1939_v18 = vadd.f32 %v1938_v12, %v1841_v5 }
 0x251   :  { %v3045_v7 = vpop.f32.mrf.mxu0 }
 0x252   :  { %v2053_v11 = vadd.f32 %v3045_v7, %v1934_v6 }
 0x253   :  { %v2033_v13 = vpop.f32.mrf.mxu0 }
 0x254   :  { %v2062_v15 = vadd.f32 %v2938_v8, %v2053_v11  ;;  %v2052_v16 = vadd.f32 %v2033_v13, %v1929_v10 }
 0x255   :  { %v3048_v17 = vpop.f32.mrf.mxu0 }
 0x256   :  { %v2066_v19 = vmax.f32 %v2062_v15, 0.0  ;;  %v2061_v20 = vadd.f32 %v2938_v8, %v2052_v16  ;;  %v2055_v21 = vadd.f32 %v3048_v17, %v1944_v14 }
 0x257   :  { %v2043_v22 = vpop.f32.mrf.mxu0 }
 0x258   :  { %v2075_v23 = vsel %vm2073_vm2, %v2066_v19, 0.0  ;;  %v2065_v24 = vmax.f32 %v2061_v20, 0.0  ;;  %v2064_v25 = vadd.f32 %v2938_v8, %v2055_v21  ;;  %v2054_v26 = vadd.f32 %v2043_v22, %v1939_v18 }
 0x259   :  { %v2080_v27 = vsel %vm2078_vm3, %v2075_v23, -inf }
 0x25a   :  { %v2079_v28 = vsel %vm2078_vm3, %v2065_v24, -inf  ;;  %v2068_v29 = vmax.f32 %v2064_v25, 0.0  ;;  %v2063_v30 = vadd.f32 %v2938_v8, %v2054_v26 }
 0x25b   :  { %v2081_v31 = vmax.f32 %v2079_v28, %v2080_v27 }
 0x25c   :  { %v2077_v32 = vsel %vm2073_vm2, %v2068_v29, 0.0  ;;  %v2067_v33 = vmax.f32 %v2063_v30, 0.0 }
 0x25d   :  { %v2082_v34 = vrot.slane %v2081_v31, 4  ;;  %v2089_v35 = vsel %vm2078_vm3, %v2077_v32, -inf }
 0x25e   :  { %v2088_v36 = vsel %vm2078_vm3, %v2067_v33, -inf }
 0x25f   :  { %v2083_v37 = vmax.f32 %v2081_v31, %v2082_v34  ;;  %v2090_v38 = vmax.f32 %v2088_v36, %v2089_v35 }
 0x261   :  { %v2084_v39 = vrot.slane %v2083_v37, 2  ;;  %v2091_v40 = vrot.slane %v2090_v38, 4 }
 0x263   :  { %v2085_v41 = vmax.f32 %v2083_v37, %v2084_v39  ;;  %v2092_v42 = vmax.f32 %v2090_v38, %v2091_v40 }
 0x265   :  { %v2093_v43 = vrot.slane %v2092_v42, 2  ;;  %v2086_v44 = vrot.slane %v2085_v41, 1 }
 0x267   :  { %v2094_v45 = vmax.f32 %v2092_v42, %v2093_v43  ;;  %v2087_v47 = vmax.f32 %v2085_v41, %v2086_v44 }
 0x269   :  { %v2095_v46 = vrot.slane %v2094_v45, 1 }
 0x26b   :  { %v2096_v48 = vmax.f32 %v2094_v45, %v2095_v46 }
 0x26d   :  { %v2100_v49 = vsel %vm2099_vm4, %v2096_v48, %v2087_v47 }
 0x26e   :  { %v2103_v50 = vsel %vm2102_vm5, %v2100_v49, 0.0 }
 0x26f   :  { %3054 = vmatmul.mubr.msk.f32.vlgmr.msra.gmra.mxu1 %vm2078_vm3, %v2103_v50 }
 0x32f   :  { %v2180_v55 = vpop.f32.mrf.mxu1 }
 0x330   :  { %v2181_v56 = vadd.f32 %v2939_v54, %v2180_v55 }
 0x331   :  { %v3055_v57 = vpop.f32.mrf.mxu1 }
 0x332   :  { %v2184_v58 = vmax.f32 %v2181_v56, 0.0 }
 0x334   :  { %3065 = vmatmul.mubr.msk.f32.vlgmr.msra.gmra.mxu0 %vm40_vm0, %v2184_v58 }
 0x3f4   :  { %v2263_v60 = vpop.f32.mrf.mxu0 }
 0x3f5   :  { %v2264_v61 = vadd.f32 %v2941_v59, %v2263_v60 }
 0x3f6   :  { %v3066_v62 = vpop.f32.mrf.mxu0 }
 0x3f7   :  { %v2267_v63 = vsub.f32 0.0, %v2264_v61 }
 0x3f9   :  { %v2268_v1 = vmul.f32 1.442695, %v2267_v63 }
 0x3fb   :  { %3074 = vpow2.f32 %v2268_v1 }
 0x408   :  { %v3075_v2 = vpop.eup %3074 }
 0x409   :  { %v2270_v3 = vadd.f32 1.0, %v3075_v2 }
 0x40b   :  { %3076 = vrcp.f32 %v2270_v3 }
 0x418   :  { %v3077_v0 = vpop.eup %3076 }
 0x419   :  { %2272 = vst [vmem:[#allocation9] sm:$0xff] %v3077_v0 }
 0x41a   :  { %3121 = shalt.err (!%p3118_p0)
}
 0x41b   :  { %2282 = dma.vmem_to_hbm [thread:$0]  %s2280_s7, 128, %s3365_s3, [#allocation6]  }
 0x41c   :  { %3198 = dma.done.wait [#allocation6], 128  }
 0x41d   :  { %3199 = vsyncadd [#allocation6], 4294967168 }
 0x41e   :  { %2286 = vsyncpa [#allocation5], 1 }
 0x41f   :  { %2287 = vsyncpa [#allocation6], 1 }
 0x420   :  { %2288 = vsyncpa [#allocation7], 1 }
 0x421   :  { %2289 = vsyncmov [#allocation3] }
 0x424   :  { %s2290_s11 = vpop.sfrf %2289 }
 0x425   :  { %p2943_p1 = scmp.ne.s32.totalorder %s2290_s11, 0 }
 0x427   :  { %2294 = shalt.err (%p2943_p1)  }
 0x428   :  { %2296 = vsyncmov [#allocation3 + $0x1] }
 0x42b   :  { %s2297_s12 = vpop.sfrf %2296 }
 0x42c   :  { %p2944_p2 = scmp.ne.s32.totalorder %s2297_s12, 0 }
 0x42e   :  { %2301 = shalt.err (%p2944_p2)  }
 0x42f   :  { %2303 = vsyncmov [#allocation3 + $0x2] }
 0x432   :  { %s2304_s13 = vpop.sfrf %2303 }
 0x433   :  { %p2945_p3 = scmp.ne.s32.totalorder %s2304_s13, 0 }
 0x435   :  { %2308 = shalt.err (%p2945_p3)  }
 0x436   :  { %2310 = vsyncmov [#allocation3 + $0x3] }
 0x439   :  { %s2311_s14 = vpop.sfrf %2310 }
 0x43a   :  { %p2946_p4 = scmp.ne.s32.totalorder %s2311_s14, 0 }
 0x43c   :  { %2315 = shalt.err (%p2946_p4)  }
 0x43d   :  { %2317 = vsyncmov [#allocation3 + $0x4] }
 0x440   :  { %s2318_s3 = vpop.sfrf %2317 }
 0x441   :  { %p2947_p5 = scmp.ne.s32.totalorder %s2318_s3, 0 }
 0x443   :  { %2322 = shalt.err (%p2947_p5)  }
 0x444   :  { %2324 = vsyncmov [#allocation3 + $0x5] }
 0x447   :  { %s2325_s15 = vpop.sfrf %2324 }
 0x448   :  { %p2948_p6 = scmp.ne.s32.totalorder %s2325_s15, 0 }
 0x44a   :  { %2329 = shalt.err (%p2948_p6)  }
 0x44b   :  { %2331 = vsyncmov [#allocation3 + $0x6] }
 0x44e   :  { %s2332_s16 = vpop.sfrf %2331 }
 0x44f   :  { %p2949_p7 = scmp.ne.s32.totalorder %s2332_s16, 0 }
 0x451   :  { %2336 = shalt.err (%p2949_p7)  }
 0x452   :  { %2338 = vsyncmov [#allocation3 + $0x7] }
 0x455   :  { %s2339_s17 = vpop.sfrf %2338 }
 0x456   :  { %p2950_p8 = scmp.ne.s32.totalorder %s2339_s17, 0 }
 0x458   :  { %2343 = shalt.err (%p2950_p8)  }
 0x459   :  { %2345 = vsyncmov [#allocation3 + $0x8] }
 0x45c   :  { %s2346_s18 = vpop.sfrf %2345 }
 0x45d   :  { %p2951_p9 = scmp.ne.s32.totalorder %s2346_s18, 0 }
 0x45f   :  { %2350 = shalt.err (%p2951_p9)  }
 0x460   :  { %2352 = vsyncmov [#allocation3 + $0x9] }
 0x463   :  { %s2353_s19 = vpop.sfrf %2352 }
 0x464   :  { %p2952_p10 = scmp.ne.s32.totalorder %s2353_s19, 0 }
 0x466   :  { %2357 = shalt.err (%p2952_p10)  }
 0x467   :  { %2359 = vsyncmov [#allocation3 + $0xa] }
 0x46a   :  { %s2360_s0 = vpop.sfrf %2359 }
 0x46b   :  { %p2953_p11 = scmp.ne.s32.totalorder %s2360_s0, 0 }
 0x46d   :  { %2364 = shalt.err (%p2953_p11)  }
 0x46e   :  { %2366 = vsyncmov [#allocation3 + $0xb] }
 0x471   :  { %s2367_s20 = vpop.sfrf %2366 }
 0x472   :  { %p2954_p12 = scmp.ne.s32.totalorder %s2367_s20, 0 }
 0x474   :  { %2371 = shalt.err (%p2954_p12)  }
 0x475   :  { %2373 = vsyncmov [#allocation3 + $0xc] }
 0x478   :  { %s2374_s21 = vpop.sfrf %2373 }
 0x479   :  { %p2955_p13 = scmp.ne.s32.totalorder %s2374_s21, 0 }
 0x47b   :  { %2378 = shalt.err (%p2955_p13)  }
 0x47c   :  { %2380 = vsyncmov [#allocation3 + $0xd] }
 0x47f   :  { %s2381_s22 = vpop.sfrf %2380 }
 0x480   :  { %p2956_p0 = scmp.ne.s32.totalorder %s2381_s22, 0 }
 0x482   :  { %2385 = shalt.err (%p2956_p0)  }
 0x483   :  { %2387 = vsyncmov [#allocation3 + $0xe] }
 0x486   :  { %s2388_s23 = vpop.sfrf %2387 }
 0x487   :  { %p2957_p1 = scmp.ne.s32.totalorder %s2388_s23, 0 }
 0x489   :  { %2392 = shalt.err (%p2957_p1)  }
 0x48a   :  { %2394 = vsyncmov [#allocation3 + $0xf] }
 0x48d   :  { %s2395_s24 = vpop.sfrf %2394 }
 0x48e   :  { %p2958_p2 = scmp.ne.s32.totalorder %s2395_s24, 0 }
 0x490   :  { %2399 = shalt.err (%p2958_p2)  }
 0x491   :  { %2401 = vsyncmov [#allocation3 + $0x10] }
 0x494   :  { %s2402_s25 = vpop.sfrf %2401 }
 0x495   :  { %p2959_p3 = scmp.ne.s32.totalorder %s2402_s25, 0 }
 0x497   :  { %2406 = shalt.err (%p2959_p3)  }
 0x498   :  { %2408 = vsyncmov [#allocation3 + $0x11] }
 0x49b   :  { %s2409_s26 = vpop.sfrf %2408 }
 0x49c   :  { %p2960_p4 = scmp.ne.s32.totalorder %s2409_s26, 0 }
 0x49e   :  { %2413 = shalt.err (%p2960_p4)  }
 0x49f   :  { %2415 = vsyncmov [#allocation3 + $0x12] }
 0x4a2   :  { %s2416_s27 = vpop.sfrf %2415 }
 0x4a3   :  { %p2961_p5 = scmp.ne.s32.totalorder %s2416_s27, 0 }
 0x4a5   :  { %2420 = shalt.err (%p2961_p5)  }
 0x4a6   :  { %2422 = vsyncmov [#allocation3 + $0x13] }
 0x4a9   :  { %s2423_s2 = vpop.sfrf %2422 }
 0x4aa   :  { %p2962_p6 = scmp.ne.s32.totalorder %s2423_s2, 0 }
 0x4ac   :  { %2427 = shalt.err (%p2962_p6)  }
 0x4ad   :  { %2429 = vsyncmov [#allocation3 + $0x14] }
 0x4b0   :  { %s2430_s28 = vpop.sfrf %2429 }
 0x4b1   :  { %p2963_p7 = scmp.ne.s32.totalorder %s2430_s28, 0 }
 0x4b3   :  { %2434 = shalt.err (%p2963_p7)  }
 0x4b4   :  { %2436 = vsyncmov [#allocation3 + $0x15] }
 0x4b7   :  { %s2437_s29 = vpop.sfrf %2436 }
 0x4b8   :  { %p2964_p8 = scmp.ne.s32.totalorder %s2437_s29, 0 }
 0x4ba   :  { %2441 = shalt.err (%p2964_p8)  }
 0x4bb   :  { %2443 = vsyncmov [#allocation3 + $0x16] }
 0x4be   :  { %s2444_s30 = vpop.sfrf %2443 }
 0x4bf   :  { %p2965_p9 = scmp.ne.s32.totalorder %s2444_s30, 0 }
 0x4c1   :  { %2448 = shalt.err (%p2965_p9)  }
 0x4c2   :  { %2450 = vsyncmov [#allocation3 + $0x17] }
 0x4c5   :  { %s2451_s4 = vpop.sfrf %2450 }
 0x4c6   :  { %p2966_p10 = scmp.ne.s32.totalorder %s2451_s4, 0 }
 0x4c8   :  { %2455 = shalt.err (%p2966_p10)  }
 0x4c9   :  { %2457 = vsyncmov [#allocation3 + $0x18] }
 0x4cc   :  { %s2458_s5 = vpop.sfrf %2457 }
 0x4cd   :  { %p2967_p11 = scmp.ne.s32.totalorder %s2458_s5, 0 }
 0x4cf   :  { %2462 = shalt.err (%p2967_p11)  }
 0x4d0   :  { %2464 = vsyncmov [#allocation3 + $0x19] }
 0x4d3   :  { %s2465_s6 = vpop.sfrf %2464 }
 0x4d4   :  { %p2968_p12 = scmp.ne.s32.totalorder %s2465_s6, 0 }
 0x4d6   :  { %2469 = shalt.err (%p2968_p12)  }
 0x4d7   :  { %2471 = vsyncmov [#allocation3 + $0x1a] }
 0x4da   :  { %s2472_s1 = vpop.sfrf %2471 }
 0x4db   :  { %p2969_p13 = scmp.ne.s32.totalorder %s2472_s1, 0 }
 0x4dd   :  { %2476 = shalt.err (%p2969_p13)  }
 0x4de   :  { %2478 = vsyncmov [#allocation3 + $0x1b] }
 0x4e1   :  { %s2479_s7 = vpop.sfrf %2478 }
 0x4e2   :  { %p2970_p0 = scmp.ne.s32.totalorder %s2479_s7, 0 }
 0x4e4   :  { %2483 = shalt.err (%p2970_p0)  }
 0x4e5   :  { %2485 = vsyncmov [#allocation3 + $0x1c] }
 0x4e8   :  { %s2486_s8 = vpop.sfrf %2485 }
 0x4e9   :  { %p2971_p1 = scmp.ne.s32.totalorder %s2486_s8, 0 }
 0x4eb   :  { %2490 = shalt.err (%p2971_p1)  }
 0x4ec   :  { %2492 = vsyncmov [#allocation3 + $0x1d] }
 0x4ef   :  { %s2493_s9 = vpop.sfrf %2492 }
 0x4f0   :  { %p2972_p2 = scmp.ne.s32.totalorder %s2493_s9, 0 }
 0x4f2   :  { %2497 = shalt.err (%p2972_p2)  }
 0x4f3   :  { %2499 = vsyncmov [#allocation3 + $0x1e] }
 0x4f6   :  { %s2500_s10 = vpop.sfrf %2499 }
 0x4f7   :  { %p2973_p3 = scmp.ne.s32.totalorder %s2500_s10, 0 }
 0x4f9   :  { %2504 = shalt.err (%p2973_p3)  }
 0x4fa   :  { %2506 = vsyncmov [#allocation3 + $0x1f] }
 0x4fd   :  { %s2507_s11 = vpop.sfrf %2506 }
 0x4fe   :  { %p2974_p4 = scmp.ne.s32.totalorder %s2507_s11, 0 }
 0x500   :  { %2511 = shalt.err (%p2974_p4)  }

</bundles_post_ra>
